<compile_context>
chip_gen: v6e
topology: v6e:2x2x1
jax: 0.10.0
libtpu: 0.0.40
codegen_flags: <defaults>
</compile_context>

<pallas_src>
import jax
import jax.numpy as jnp
from jax.experimental import pallas as pl
from jax.experimental.pallas import tpu as pltpu

# ---- config = module defaults (embed_dim=128, num_heads=8, ffn_ratio=4), small seq/batch ----
SEQ = 8
BATCH = 2
EMBED = 128
HEADS = 8
HEAD_DIM = EMBED // HEADS
FFN = EMBED * 4
NROWS = SEQ * BATCH          # flattened token rows (16)
HN = HEADS * NROWS           # stacked head-rows for block-diagonal attention (128)
LN_EPS = 1e-5
NEG = -1.0e9


# ----------------------------- in-kernel math helpers -----------------------------
def _layer_norm(x, w, b):
    mu = jnp.mean(x, axis=-1, keepdims=True)
    var = jnp.mean(jnp.square(x - mu), axis=-1, keepdims=True)
    return (x - mu) * jax.lax.rsqrt(var + LN_EPS) * w + b


def _erf_f32(x):
    # Eigen/XLA float32 rational approximation of erf; basic VPU ops only.
    x = jnp.clip(x, -3.832506856900711, 3.832506856900711)
    x2 = x * x
    alphas = (-2.72614225801306e-10, 2.77068142495902e-08, -2.10102402082508e-06,
              -5.69250639462346e-05, -7.34990630326855e-04, -2.95459980854025e-03,
              -1.60960333262415e-02)
    betas = (-1.45660718464996e-05, -2.13374055278905e-04, -1.68282697438203e-03,
             -7.37332916720468e-03, -1.42647390514189e-02)
    p = jnp.float32(alphas[0])
    for c in alphas[1:]:
        p = p * x2 + c
    p = p * x
    q = jnp.float32(betas[0])
    for c in betas[1:]:
        q = q * x2 + c
    return p / q


def _gelu_exact(x):
    # torch.nn.GELU() default = exact (erf-based) gelu
    return 0.5 * x * (1.0 + _erf_f32(x * 0.7071067811865476))


# ----------------------------------- the kernel -----------------------------------
# vec_e rows: 0 ln1_w, 1 ln1_b, 2 ln2_w, 3 ln2_b, 4 ln3_w, 5 ln3_b, 6 bo_eff, 7 fc2_b, 8 w_resid
# vec_f rows: 0 fc1_b, 1 ln4_w, 2 ln4_b, 3 bqkv (padded to FFN width)
def block_kernel(x_ref, mask_ref, hsel_ref, wqkv_ref, wo_ref, w1_ref, w2_ref,
                 vece_ref, vecf_ref, o_ref):
    x = x_ref[...]                                   # (N, E) f32, N = S*B
    residual = x

    # ---- pre-attention LayerNorm + fused QKV projection (q-scale folded into wqkv) ----
    h = _layer_norm(x, vece_ref[0:1], vece_ref[1:2])
    qkv = jnp.dot(h.astype(jnp.bfloat16), wqkv_ref[...],
                  preferred_element_type=jnp.float32) + vecf_ref[3:4, 0:3 * EMBED]
    q = qkv[:, 0:EMBED]                              # lane slices at 128-aligned offsets
    k = qkv[:, EMBED:2 * EMBED]
    v = qkv[:, 2 * EMBED:3 * EMBED]

    # ---- block-diagonal attention: heads stacked along rows, one full 128x128 matmul ----
    hsel = hsel_ref[...]                             # (H*N, E) bf16 head-selection slab
    qb = q.astype(jnp.bfloat16)
    kb = k.astype(jnp.bfloat16)
    vb = v.astype(jnp.bfloat16)
    qr = jnp.concatenate([qb] * HEADS, axis=0)       # (H*N, E), raw (additive mask handles heads)
    km = jnp.concatenate([kb] * HEADS, axis=0) * hsel
    vm = jnp.concatenate([vb] * HEADS, axis=0) * hsel

    scores = jax.lax.dot_general(qr, km, (((1,), (1,)), ((), ())),
                                 preferred_element_type=jnp.float32)      # (H*N, H*N)
    # additive mask: off-diagonal head blocks, cross-batch pairs, padded keys -> -1e9
    scores = scores + mask_ref[...]
    scores = scores - jnp.max(scores, axis=-1, keepdims=True)
    p = jnp.exp(scores)
    p = p / jnp.sum(p, axis=-1, keepdims=True)       # exact normalisation (f32 divide)

    ctx = jnp.dot(p.astype(jnp.bfloat16), vm,
                  preferred_element_type=jnp.float32)                     # (H*N, E)
    # row-group h carries head h's context in its disjoint lane block -> sum assembles heads
    attn = ctx[0:NROWS]
    for hh in range(1, HEADS):
        attn = attn + ctx[hh * NROWS:(hh + 1) * NROWS]                    # (N, E)

    # ---- output projection (c_attn scale + permutation folded into wo) + LN2 + residual ----
    a = jnp.dot(attn.astype(jnp.bfloat16), wo_ref[...],
                preferred_element_type=jnp.float32) + vece_ref[6:7]
    a = _layer_norm(a, vece_ref[2:3], vece_ref[3:4])
    x1 = a + residual                                # dropout is identity in eval mode

    # ---- feed-forward block ----
    f = _layer_norm(x1, vece_ref[4:5], vece_ref[5:6])
    f = jnp.dot(f.astype(jnp.bfloat16), w1_ref[...],
                preferred_element_type=jnp.float32) + vecf_ref[0:1]
    f = _gelu_exact(f)
    f = _layer_norm(f, vecf_ref[1:2], vecf_ref[2:3])
    y = jnp.dot(f.astype(jnp.bfloat16), w2_ref[...],
                preferred_element_type=jnp.float32) + vece_ref[7:8]
    o_ref[...] = y + vece_ref[8:9] * x1


# --------------------------- one-time parameter preparation ------------------------
def head_scale_permute_matrix(c_attn):
    # x_out[:, d*H + h] = x_in[:, h*Hd + d] * c_attn[h]
    h_idx = jnp.repeat(jnp.arange(HEADS), HEAD_DIM)
    d_idx = jnp.tile(jnp.arange(HEAD_DIM), HEADS)
    src = jnp.arange(EMBED)
    dst = d_idx * HEADS + h_idx
    return jnp.zeros((EMBED, EMBED), jnp.float32).at[src, dst].set(c_attn[h_idx])


def prepare_block_params(p):
    """All weight algebra, done ONCE at parameter-load time (hoisted out of the call path)."""
    E, F = EMBED, FFN
    scale = HEAD_DIM ** -0.5
    wq = p['in_proj_w'][:E].T * scale
    wk = p['in_proj_w'][E:2 * E].T
    wv = p['in_proj_w'][2 * E:].T
    bq = p['in_proj_b'][:E] * scale
    bk = p['in_proj_b'][E:2 * E]
    bv = p['in_proj_b'][2 * E:]
    wqkv = jnp.concatenate([wq, wk, wv], axis=1)            # (E, 3E)
    bqkv = jnp.concatenate([bq, bk, bv])                    # (3E,)

    pmat = head_scale_permute_matrix(p['c_attn'])           # (E, E)
    wo_eff = p['out_proj_w'].T @ pmat                       # (E, E)
    bo_eff = p['out_proj_b'] @ pmat                         # (E,)

    vec_e = jnp.stack([p['ln1_w'], p['ln1_b'], p['ln2_w'], p['ln2_b'],
                       p['ln3_w'], p['ln3_b'], bo_eff, p['fc2_b'], p['w_resid']])  # (9, E)
    bqkv_row = jnp.zeros((F,), jnp.float32).at[:3 * E].set(bqkv)
    vec_f = jnp.stack([p['fc1_b'], p['ln4_w'], p['ln4_b'], bqkv_row])              # (4, F)

    # head-selection slab: row h*N+i selects head h's feature block (0/1, exact in bf16)
    row_h = jnp.arange(HN) // NROWS
    hsel = (jnp.arange(E)[None, :] // HEAD_DIM == row_h[:, None]).astype(jnp.bfloat16)

    # structural part of the additive score mask: off-diagonal head blocks + cross-batch pairs
    row_b = (jnp.arange(HN) % NROWS) % BATCH
    struct = ((row_h[:, None] != row_h[None, :]) |
              (row_b[:, None] != row_b[None, :])).astype(jnp.float32) * NEG         # (HN, HN)

    return dict(
        wqkv=wqkv.astype(jnp.bfloat16), wo=wo_eff.astype(jnp.bfloat16),
        w1=p['fc1_w'].T.astype(jnp.bfloat16), w2=p['fc2_w'].T.astype(jnp.bfloat16),
        vec_e=vec_e, vec_f=vec_f, hsel=hsel, struct_mask=struct,
        bqkv=bqkv, bo=bo_eff)   # f32 copies used by the matched-precision reference


# --------------------------------- wrapper (glue) ----------------------------------
@jax.jit
def block_forward(x_sbe, padding_mask, prep):
    S, B, E = x_sbe.shape
    N = S * B
    # contiguous collapse, no transpose: flat row j <-> (s = j // B, b = j % B)
    x_flat = x_sbe.astype(jnp.float32).reshape(N, E)

    # runtime-dependent part of the mask: padded-key columns (replicated per head block)
    pad_key = jnp.transpose(padding_mask.astype(jnp.float32)).reshape(N)
    attn_mask = prep['struct_mask'] + jnp.tile(pad_key, HEADS)[None, :] * NEG        # (HN, HN)

    inputs = (x_flat, attn_mask, prep['hsel'], prep['wqkv'], prep['wo'],
              prep['w1'], prep['w2'], prep['vec_e'], prep['vec_f'])
    in_specs = [pl.BlockSpec(a.shape, lambda i: (0, 0)) for a in inputs]   # all 2-D full blocks

    out = pl.pallas_call(
        block_kernel,
        out_shape=jax.ShapeDtypeStruct((N, E), jnp.float32),
        grid_spec=pltpu.PrefetchScalarGridSpec(
            num_scalar_prefetch=0,
            grid=(1,),                                   # whole (small) batch in one step
            in_specs=in_specs,
            out_specs=pl.BlockSpec((N, E), lambda i: (0, 0)),
        ),
        compiler_params=pltpu.CompilerParams(dimension_semantics=("arbitrary",)),
    )(*inputs)
    return out.reshape(S, B, E)


# ------------------------------ pure-JAX references --------------------------------
def _ln_ref(x, w, b):
    mu = jnp.mean(x, axis=-1, keepdims=True)
    var = jnp.mean(jnp.square(x - mu), axis=-1, keepdims=True)
    return (x - mu) * jax.lax.rsqrt(var + LN_EPS) * w + b


def block_reference(x, padding_mask, p):
    """Exact f32 reference of the torch module (x_cls=None, eval mode)."""
    S, B, E = x.shape
    residual = x
    h = _ln_ref(x, p['ln1_w'], p['ln1_b'])
    wq, wk, wv = jnp.split(p['in_proj_w'], 3, axis=0)
    bq, bk, bv = jnp.split(p['in_proj_b'], 3)
    q = (jnp.einsum('sbe,fe->sbf', h, wq) + bq) * (HEAD_DIM ** -0.5)
    k = jnp.einsum('sbe,fe->sbf', h, wk) + bk
    v = jnp.einsum('sbe,fe->sbf', h, wv) + bv
    q = q.reshape(S, B, HEADS, HEAD_DIM)
    k = k.reshape(S, B, HEADS, HEAD_DIM)
    v = v.reshape(S, B, HEADS, HEAD_DIM)
    scores = jnp.einsum('sbhd,tbhd->bhst', q, k)
    scores = scores + (padding_mask.astype(jnp.float32) * NEG)[:, None, None, :]
    attn = jax.nn.softmax(scores, axis=-1)
    o = jnp.einsum('bhst,tbhd->sbhd', attn, v).reshape(S, B, E)
    o = jnp.einsum('sbe,fe->sbf', o, p['out_proj_w']) + p['out_proj_b']
    o = o.reshape(S, B, HEADS, HEAD_DIM)
    o = jnp.einsum('tbhd,h->tbdh', o, p['c_attn']).reshape(S, B, E)
    o = _ln_ref(o, p['ln2_w'], p['ln2_b'])
    x1 = o + residual
    f = _ln_ref(x1, p['ln3_w'], p['ln3_b'])
    f = jnp.einsum('sbe,fe->sbf', f, p['fc1_w']) + p['fc1_b']
    f = jax.nn.gelu(f, approximate=False)
    f = _ln_ref(f, p['ln4_w'], p['ln4_b'])
    y = jnp.einsum('sbf,ef->sbe', f, p['fc2_w']) + p['fc2_b']
    return y + p['w_resid'] * x1


def matched_reference(x_sbe, padding_mask, p, prep):
    """Plain-JAX reference using the SAME bf16 matmul operands / folded weights as the kernel.
    Validates the kernel structure tightly; differences are only backend rounding."""
    S, B, E = x_sbe.shape
    N = S * B
    x = x_sbe.astype(jnp.float32).reshape(N, E)
    b_idx = jnp.arange(N) % B
    padk = jnp.transpose(padding_mask.astype(jnp.float32)).reshape(N)
    pair_neg = (b_idx[:, None] != b_idx[None, :]).astype(jnp.float32) * NEG + padk[None, :] * NEG

    h = _ln_ref(x, p['ln1_w'], p['ln1_b'])
    qkv = jnp.dot(h.astype(jnp.bfloat16), prep['wqkv'],
                  preferred_element_type=jnp.float32) + prep['bqkv']
    q, k, v = qkv[:, :E], qkv[:, E:2 * E], qkv[:, 2 * E:]
    qb = q.astype(jnp.bfloat16).reshape(N, HEADS, HEAD_DIM)
    kb = k.astype(jnp.bfloat16).reshape(N, HEADS, HEAD_DIM)
    vb = v.astype(jnp.bfloat16).reshape(N, HEADS, HEAD_DIM)
    s = jnp.einsum('ihd,jhd->hij', qb, kb, preferred_element_type=jnp.float32)
    s = s + pair_neg[None]
    s = s - jnp.max(s, axis=-1, keepdims=True)
    pr = jnp.exp(s)
    pr = pr / jnp.sum(pr, axis=-1, keepdims=True)
    ctx = jnp.einsum('hij,jhd->ihd', pr.astype(jnp.bfloat16), vb,
                     preferred_element_type=jnp.float32)
    attn = ctx.reshape(N, E)
    a = jnp.dot(attn.astype(jnp.bfloat16), prep['wo'],
                preferred_element_type=jnp.float32) + prep['bo']
    a = _ln_ref(a, p['ln2_w'], p['ln2_b'])
    x1 = a + x
    f = _ln_ref(x1, p['ln3_w'], p['ln3_b'])
    f = jnp.dot(f.astype(jnp.bfloat16), prep['w1'],
                preferred_element_type=jnp.float32) + p['fc1_b']
    f = _gelu_exact(f)
    f = _ln_ref(f, p['ln4_w'], p['ln4_b'])
    y = jnp.dot(f.astype(jnp.bfloat16), prep['w2'],
                preferred_element_type=jnp.float32) + p['fc2_b']
    return (y + p['w_resid'] * x1).reshape(S, B, E)


# ----------------------------- deterministic parameters ----------------------------
def make_params(key):
    k = jax.random.split(key, 20)
    std = 0.05
    nrm = lambda kk, shape: std * jax.random.normal(kk, shape, jnp.float32)
    return dict(
        ln1_w=1.0 + 0.1 * jax.random.normal(k[7], (EMBED,), jnp.float32),
        ln1_b=0.1 * jax.random.normal(k[8], (EMBED,), jnp.float32),
        in_proj_w=nrm(k[0], (3 * EMBED, EMBED)),
        in_proj_b=nrm(k[1], (3 * EMBED,)),
        out_proj_w=nrm(k[2], (EMBED, EMBED)),
        out_proj_b=nrm(k[9], (EMBED,)),
        c_attn=1.0 + 0.1 * jnp.arange(HEADS, dtype=jnp.float32) / HEADS,
        ln2_w=1.0 + 0.1 * jax.random.normal(k[10], (EMBED,), jnp.float32),
        ln2_b=0.1 * jax.random.normal(k[11], (EMBED,), jnp.float32),
        ln3_w=1.0 + 0.1 * jax.random.normal(k[12], (EMBED,), jnp.float32),
        ln3_b=0.1 * jax.random.normal(k[13], (EMBED,), jnp.float32),
        fc1_w=nrm(k[3], (FFN, EMBED)),
        fc1_b=nrm(k[4], (FFN,)),
        ln4_w=1.0 + 0.1 * jax.random.normal(k[14], (FFN,), jnp.float32),
        ln4_b=0.1 * jax.random.normal(k[15], (FFN,), jnp.float32),
        fc2_w=nrm(k[5], (EMBED, FFN)),
        fc2_b=nrm(k[6], (EMBED,)),
        w_resid=1.0 - 0.1 * jnp.arange(EMBED, dtype=jnp.float32) / EMBED,
    )


if __name__ == "__main__":
    key = jax.random.PRNGKey(0)
    kx, kp = jax.random.split(key, 2)
    x = jax.random.normal(kx, (SEQ, BATCH, EMBED), jnp.float32)
    # binary padding mask (batch, seq): last two positions padded
    padding_mask = jnp.zeros((BATCH, SEQ), jnp.float32).at[:, -2:].set(1.0)
    params = make_params(kp)

    prep = prepare_block_params(params)        # hoisted: once per parameter load, not per call
    out = jax.block_until_ready(block_forward(x, padding_mask, prep))
    assert out.shape == (SEQ, BATCH, EMBED)

    # 1) tight structural check vs a reference that uses the same bf16 matmul operands
    ref_matched = matched_reference(x, padding_mask, params, prep)
    err_matched = float(jnp.max(jnp.abs(out - ref_matched)))
    if err_matched > 5e-3:
        raise SystemExit(f"mismatch vs matched-precision reference: max abs err = {err_matched}")

    # 2) loose check vs the exact f32 torch-semantics reference; the tolerance budgets the
    #    bf16 matmul rounding amplified by the four LayerNorms (weights here have std 0.05,
    #    so the post-attn/post-fc LayerNorms amplify absolute errors by ~3-6x each).
    ref_exact = block_reference(x, padding_mask, params)
    if not bool(jnp.allclose(out, ref_exact, atol=3e-2, rtol=3e-2)):
        err_exact = float(jnp.max(jnp.abs(out - ref_exact)))
        raise SystemExit(f"mismatch vs exact f32 reference: max abs err = {err_exact}")

    print("KERNEL_OK")
</pallas_src>

<mosaic_0001>
module attributes {stable_mosaic.version = 11 : i64} {
  func.func @block_kernel(%arg0: i32, %arg1: memref<16x128xf32, #tpu.memory_space<vmem>>, %arg2: memref<128x128xf32, #tpu.memory_space<vmem>>, %arg3: memref<128x128xbf16, #tpu.memory_space<vmem>>, %arg4: memref<128x384xbf16, #tpu.memory_space<vmem>>, %arg5: memref<128x128xbf16, #tpu.memory_space<vmem>>, %arg6: memref<128x512xbf16, #tpu.memory_space<vmem>>, %arg7: memref<512x128xbf16, #tpu.memory_space<vmem>>, %arg8: memref<9x128xf32, #tpu.memory_space<vmem>>, %arg9: memref<4x512xf32, #tpu.memory_space<vmem>>, %arg10: memref<16x128xf32, #tpu.memory_space<vmem>>) attributes {dimension_semantics = [#tpu.dimension_semantics<arbitrary>], iteration_bounds = array<i64: 1>, scalar_prefetch = 0 : i64, scratch_operands = 0 : i64, tpu.core_type = #tpu.core_type<tc>, window_params = [{pipeline_mode = #tpu.pipeline_mode<synchronous>, transform_indices = @transform_0, window_bounds = array<i64: 16, 128>}, {pipeline_mode = #tpu.pipeline_mode<synchronous>, transform_indices = @transform_1, window_bounds = array<i64: 128, 128>}, {pipeline_mode = #tpu.pipeline_mode<synchronous>, transform_indices = @transform_2, window_bounds = array<i64: 128, 128>}, {pipeline_mode = #tpu.pipeline_mode<synchronous>, transform_indices = @transform_3, window_bounds = array<i64: 128, 384>}, {pipeline_mode = #tpu.pipeline_mode<synchronous>, transform_indices = @transform_4, window_bounds = array<i64: 128, 128>}, {pipeline_mode = #tpu.pipeline_mode<synchronous>, transform_indices = @transform_5, window_bounds = array<i64: 128, 512>}, {pipeline_mode = #tpu.pipeline_mode<synchronous>, transform_indices = @transform_6, window_bounds = array<i64: 512, 128>}, {pipeline_mode = #tpu.pipeline_mode<synchronous>, transform_indices = @transform_7, window_bounds = array<i64: 9, 128>}, {pipeline_mode = #tpu.pipeline_mode<synchronous>, transform_indices = @transform_8, window_bounds = array<i64: 4, 512>}, {pipeline_mode = #tpu.pipeline_mode<synchronous>, transform_indices = @transform_9, window_bounds = array<i64: 16, 128>}]} {
    %c0 = arith.constant 0 : index
    %c0_0 = arith.constant 0 : index
    %0 = vector.load %arg1[%c0, %c0_0] : memref<16x128xf32, #tpu.memory_space<vmem>>, vector<16x128xf32>
    %c0_1 = arith.constant 0 : index
    %c0_2 = arith.constant 0 : index
    %1 = vector.load %arg8[%c0_1, %c0_2] : memref<9x128xf32, #tpu.memory_space<vmem>>, vector<1x128xf32>
    %c1 = arith.constant 1 : index
    %c0_3 = arith.constant 0 : index
    %2 = vector.load %arg8[%c1, %c0_3] : memref<9x128xf32, #tpu.memory_space<vmem>>, vector<1x128xf32>
    %cst = arith.constant dense<0.000000e+00> : vector<16xf32>
    %3 = vector.multi_reduction <add>, %0, %cst [1] : vector<16x128xf32> to vector<16xf32>
    %4 = vector.shape_cast %3 : vector<16xf32> to vector<16x1xf32>
    %cst_4 = arith.constant 1.280000e+02 : f32
    %5 = vector.broadcast %cst_4 : f32 to vector<16x1xf32>
    %6 = arith.divf %4, %5 : vector<16x1xf32>
    %7 = vector.broadcast %6 : vector<16x1xf32> to vector<16x128xf32>
    %8 = arith.subf %0, %7 : vector<16x128xf32>
    %9 = arith.mulf %8, %8 : vector<16x128xf32>
    %cst_5 = arith.constant dense<0.000000e+00> : vector<16xf32>
    %10 = vector.multi_reduction <add>, %9, %cst_5 [1] : vector<16x128xf32> to vector<16xf32>
    %11 = vector.shape_cast %10 : vector<16xf32> to vector<16x1xf32>
    %cst_6 = arith.constant 1.280000e+02 : f32
    %12 = vector.broadcast %cst_6 : f32 to vector<16x1xf32>
    %13 = arith.divf %11, %12 : vector<16x1xf32>
    %14 = vector.broadcast %6 : vector<16x1xf32> to vector<16x128xf32>
    %15 = arith.subf %0, %14 : vector<16x128xf32>
    %cst_7 = arith.constant 9.99999974E-6 : f32
    %16 = vector.broadcast %cst_7 : f32 to vector<16x1xf32>
    %17 = arith.addf %13, %16 : vector<16x1xf32>
    %18 = math.rsqrt %17 : vector<16x1xf32>
    %19 = vector.broadcast %18 : vector<16x1xf32> to vector<16x128xf32>
    %20 = arith.mulf %15, %19 : vector<16x128xf32>
    %21 = vector.broadcast %1 : vector<1x128xf32> to vector<16x128xf32>
    %22 = arith.mulf %20, %21 : vector<16x128xf32>
    %23 = vector.broadcast %2 : vector<1x128xf32> to vector<16x128xf32>
    %24 = arith.addf %22, %23 : vector<16x128xf32>
    %25 = arith.truncf %24 : vector<16x128xf32> to vector<16x128xbf16>
    %c0_8 = arith.constant 0 : index
    %c0_9 = arith.constant 0 : index
    %26 = vector.load %arg4[%c0_8, %c0_9] : memref<128x384xbf16, #tpu.memory_space<vmem>>, vector<128x384xbf16>
    %cst_10 = arith.constant dense<0.000000e+00> : vector<16x384xf32>
    %27 = tpu.matmul %25, %26, %cst_10 {dimension_numbers = #tpu.dot_dimension_numbers<[1], [0], [0], [1], [0, 0, 1, 1], [], []>} : vector<16x128xbf16>, vector<128x384xbf16>, vector<16x384xf32> -> vector<16x384xf32>
    %c3 = arith.constant 3 : index
    %c0_11 = arith.constant 0 : index
    %28 = vector.load %arg9[%c3, %c0_11] : memref<4x512xf32, #tpu.memory_space<vmem>>, vector<1x384xf32>
    %29 = vector.broadcast %28 : vector<1x384xf32> to vector<16x384xf32>
    %30 = arith.addf %27, %29 : vector<16x384xf32>
    %31 = vector.extract_strided_slice %30 {offsets = [0, 0], sizes = [16, 128], strides = [1, 1]} : vector<16x384xf32> to vector<16x128xf32>
    %32 = vector.extract_strided_slice %30 {offsets = [0, 128], sizes = [16, 128], strides = [1, 1]} : vector<16x384xf32> to vector<16x128xf32>
    %33 = vector.extract_strided_slice %30 {offsets = [0, 256], sizes = [16, 128], strides = [1, 1]} : vector<16x384xf32> to vector<16x128xf32>
    %c0_12 = arith.constant 0 : index
    %c0_13 = arith.constant 0 : index
    %34 = vector.load %arg3[%c0_12, %c0_13] : memref<128x128xbf16, #tpu.memory_space<vmem>>, vector<128x128xbf16>
    %35 = arith.truncf %31 : vector<16x128xf32> to vector<16x128xbf16>
    %36 = arith.truncf %32 : vector<16x128xf32> to vector<16x128xbf16>
    %37 = arith.truncf %33 : vector<16x128xf32> to vector<16x128xbf16>
    %38 = tpu.concatenate %35, %35, %35, %35, %35, %35, %35, %35 in 0 : vector<16x128xbf16>, vector<16x128xbf16>, vector<16x128xbf16>, vector<16x128xbf16>, vector<16x128xbf16>, vector<16x128xbf16>, vector<16x128xbf16>, vector<16x128xbf16> -> vector<128x128xbf16>
    %39 = tpu.concatenate %36, %36, %36, %36, %36, %36, %36, %36 in 0 : vector<16x128xbf16>, vector<16x128xbf16>, vector<16x128xbf16>, vector<16x128xbf16>, vector<16x128xbf16>, vector<16x128xbf16>, vector<16x128xbf16>, vector<16x128xbf16> -> vector<128x128xbf16>
    %40 = arith.mulf %39, %34 : vector<128x128xbf16>
    %41 = tpu.concatenate %37, %37, %37, %37, %37, %37, %37, %37 in 0 : vector<16x128xbf16>, vector<16x128xbf16>, vector<16x128xbf16>, vector<16x128xbf16>, vector<16x128xbf16>, vector<16x128xbf16>, vector<16x128xbf16>, vector<16x128xbf16> -> vector<128x128xbf16>
    %42 = arith.mulf %41, %34 : vector<128x128xbf16>
    %cst_14 = arith.constant dense<0.000000e+00> : vector<128x128xf32>
    %43 = tpu.matmul %38, %40, %cst_14 {dimension_numbers = #tpu.dot_dimension_numbers<[1], [1], [0], [0], [0, 0, 1, 0], [], []>} : vector<128x128xbf16>, vector<128x128xbf16>, vector<128x128xf32> -> vector<128x128xf32>
    %c0_15 = arith.constant 0 : index
    %c0_16 = arith.constant 0 : index
    %44 = vector.load %arg2[%c0_15, %c0_16] : memref<128x128xf32, #tpu.memory_space<vmem>>, vector<128x128xf32>
    %45 = arith.addf %43, %44 : vector<128x128xf32>
    %cst_17 = arith.constant dense<0xFF800000> : vector<128xf32>
    %46 = vector.multi_reduction <maximumf>, %45, %cst_17 [1] : vector<128x128xf32> to vector<128xf32>
    %47 = vector.shape_cast %46 : vector<128xf32> to vector<128x1xf32>
    %48 = vector.broadcast %47 : vector<128x1xf32> to vector<128x128xf32>
    %49 = arith.subf %45, %48 : vector<128x128xf32>
    %50 = math.exp %49 : vector<128x128xf32>
    %cst_18 = arith.constant dense<0.000000e+00> : vector<128xf32>
    %51 = vector.multi_reduction <add>, %50, %cst_18 [1] : vector<128x128xf32> to vector<128xf32>
    %52 = vector.shape_cast %51 : vector<128xf32> to vector<128x1xf32>
    %53 = vector.broadcast %52 : vector<128x1xf32> to vector<128x128xf32>
    %54 = arith.divf %50, %53 : vector<128x128xf32>
    %55 = arith.truncf %54 : vector<128x128xf32> to vector<128x128xbf16>
    %cst_19 = arith.constant dense<0.000000e+00> : vector<128x128xf32>
    %56 = tpu.matmul %55, %42, %cst_19 {dimension_numbers = #tpu.dot_dimension_numbers<[1], [0], [0], [1], [0, 0, 1, 1], [], []>} : vector<128x128xbf16>, vector<128x128xbf16>, vector<128x128xf32> -> vector<128x128xf32>
    %57 = vector.extract_strided_slice %56 {offsets = [0, 0], sizes = [16, 128], strides = [1, 1]} : vector<128x128xf32> to vector<16x128xf32>
    %58 = vector.extract_strided_slice %56 {offsets = [16, 0], sizes = [16, 128], strides = [1, 1]} : vector<128x128xf32> to vector<16x128xf32>
    %59 = arith.addf %57, %58 : vector<16x128xf32>
    %60 = vector.extract_strided_slice %56 {offsets = [32, 0], sizes = [16, 128], strides = [1, 1]} : vector<128x128xf32> to vector<16x128xf32>
    %61 = arith.addf %59, %60 : vector<16x128xf32>
    %62 = vector.extract_strided_slice %56 {offsets = [48, 0], sizes = [16, 128], strides = [1, 1]} : vector<128x128xf32> to vector<16x128xf32>
    %63 = arith.addf %61, %62 : vector<16x128xf32>
    %64 = vector.extract_strided_slice %56 {offsets = [64, 0], sizes = [16, 128], strides = [1, 1]} : vector<128x128xf32> to vector<16x128xf32>
    %65 = arith.addf %63, %64 : vector<16x128xf32>
    %66 = vector.extract_strided_slice %56 {offsets = [80, 0], sizes = [16, 128], strides = [1, 1]} : vector<128x128xf32> to vector<16x128xf32>
    %67 = arith.addf %65, %66 : vector<16x128xf32>
    %68 = vector.extract_strided_slice %56 {offsets = [96, 0], sizes = [16, 128], strides = [1, 1]} : vector<128x128xf32> to vector<16x128xf32>
    %69 = arith.addf %67, %68 : vector<16x128xf32>
    %70 = vector.extract_strided_slice %56 {offsets = [112, 0], sizes = [16, 128], strides = [1, 1]} : vector<128x128xf32> to vector<16x128xf32>
    %71 = arith.addf %69, %70 : vector<16x128xf32>
    %72 = arith.truncf %71 : vector<16x128xf32> to vector<16x128xbf16>
    %c0_20 = arith.constant 0 : index
    %c0_21 = arith.constant 0 : index
    %73 = vector.load %arg5[%c0_20, %c0_21] : memref<128x128xbf16, #tpu.memory_space<vmem>>, vector<128x128xbf16>
    %cst_22 = arith.constant dense<0.000000e+00> : vector<16x128xf32>
    %74 = tpu.matmul %72, %73, %cst_22 {dimension_numbers = #tpu.dot_dimension_numbers<[1], [0], [0], [1], [0, 0, 1, 1], [], []>} : vector<16x128xbf16>, vector<128x128xbf16>, vector<16x128xf32> -> vector<16x128xf32>
    %c6 = arith.constant 6 : index
    %c0_23 = arith.constant 0 : index
    %75 = vector.load %arg8[%c6, %c0_23] : memref<9x128xf32, #tpu.memory_space<vmem>>, vector<1x128xf32>
    %76 = vector.broadcast %75 : vector<1x128xf32> to vector<16x128xf32>
    %77 = arith.addf %74, %76 : vector<16x128xf32>
    %c2 = arith.constant 2 : index
    %c0_24 = arith.constant 0 : index
    %78 = vector.load %arg8[%c2, %c0_24] : memref<9x128xf32, #tpu.memory_space<vmem>>, vector<1x128xf32>
    %c3_25 = arith.constant 3 : index
    %c0_26 = arith.constant 0 : index
    %79 = vector.load %arg8[%c3_25, %c0_26] : memref<9x128xf32, #tpu.memory_space<vmem>>, vector<1x128xf32>
    %cst_27 = arith.constant dense<0.000000e+00> : vector<16xf32>
    %80 = vector.multi_reduction <add>, %77, %cst_27 [1] : vector<16x128xf32> to vector<16xf32>
    %81 = vector.shape_cast %80 : vector<16xf32> to vector<16x1xf32>
    %cst_28 = arith.constant 1.280000e+02 : f32
    %82 = vector.broadcast %cst_28 : f32 to vector<16x1xf32>
    %83 = arith.divf %81, %82 : vector<16x1xf32>
    %84 = vector.broadcast %83 : vector<16x1xf32> to vector<16x128xf32>
    %85 = arith.subf %77, %84 : vector<16x128xf32>
    %86 = arith.mulf %85, %85 : vector<16x128xf32>
    %cst_29 = arith.constant dense<0.000000e+00> : vector<16xf32>
    %87 = vector.multi_reduction <add>, %86, %cst_29 [1] : vector<16x128xf32> to vector<16xf32>
    %88 = vector.shape_cast %87 : vector<16xf32> to vector<16x1xf32>
    %cst_30 = arith.constant 1.280000e+02 : f32
    %89 = vector.broadcast %cst_30 : f32 to vector<16x1xf32>
    %90 = arith.divf %88, %89 : vector<16x1xf32>
    %91 = vector.broadcast %83 : vector<16x1xf32> to vector<16x128xf32>
    %92 = arith.subf %77, %91 : vector<16x128xf32>
    %cst_31 = arith.constant 9.99999974E-6 : f32
    %93 = vector.broadcast %cst_31 : f32 to vector<16x1xf32>
    %94 = arith.addf %90, %93 : vector<16x1xf32>
    %95 = math.rsqrt %94 : vector<16x1xf32>
    %96 = vector.broadcast %95 : vector<16x1xf32> to vector<16x128xf32>
    %97 = arith.mulf %92, %96 : vector<16x128xf32>
    %98 = vector.broadcast %78 : vector<1x128xf32> to vector<16x128xf32>
    %99 = arith.mulf %97, %98 : vector<16x128xf32>
    %100 = vector.broadcast %79 : vector<1x128xf32> to vector<16x128xf32>
    %101 = arith.addf %99, %100 : vector<16x128xf32>
    %102 = arith.addf %101, %0 : vector<16x128xf32>
    %c4 = arith.constant 4 : index
    %c0_32 = arith.constant 0 : index
    %103 = vector.load %arg8[%c4, %c0_32] : memref<9x128xf32, #tpu.memory_space<vmem>>, vector<1x128xf32>
    %c5 = arith.constant 5 : index
    %c0_33 = arith.constant 0 : index
    %104 = vector.load %arg8[%c5, %c0_33] : memref<9x128xf32, #tpu.memory_space<vmem>>, vector<1x128xf32>
    %cst_34 = arith.constant dense<0.000000e+00> : vector<16xf32>
    %105 = vector.multi_reduction <add>, %102, %cst_34 [1] : vector<16x128xf32> to vector<16xf32>
    %106 = vector.shape_cast %105 : vector<16xf32> to vector<16x1xf32>
    %cst_35 = arith.constant 1.280000e+02 : f32
    %107 = vector.broadcast %cst_35 : f32 to vector<16x1xf32>
    %108 = arith.divf %106, %107 : vector<16x1xf32>
    %109 = vector.broadcast %108 : vector<16x1xf32> to vector<16x128xf32>
    %110 = arith.subf %102, %109 : vector<16x128xf32>
    %111 = arith.mulf %110, %110 : vector<16x128xf32>
    %cst_36 = arith.constant dense<0.000000e+00> : vector<16xf32>
    %112 = vector.multi_reduction <add>, %111, %cst_36 [1] : vector<16x128xf32> to vector<16xf32>
    %113 = vector.shape_cast %112 : vector<16xf32> to vector<16x1xf32>
    %cst_37 = arith.constant 1.280000e+02 : f32
    %114 = vector.broadcast %cst_37 : f32 to vector<16x1xf32>
    %115 = arith.divf %113, %114 : vector<16x1xf32>
    %116 = vector.broadcast %108 : vector<16x1xf32> to vector<16x128xf32>
    %117 = arith.subf %102, %116 : vector<16x128xf32>
    %cst_38 = arith.constant 9.99999974E-6 : f32
    %118 = vector.broadcast %cst_38 : f32 to vector<16x1xf32>
    %119 = arith.addf %115, %118 : vector<16x1xf32>
    %120 = math.rsqrt %119 : vector<16x1xf32>
    %121 = vector.broadcast %120 : vector<16x1xf32> to vector<16x128xf32>
    %122 = arith.mulf %117, %121 : vector<16x128xf32>
    %123 = vector.broadcast %103 : vector<1x128xf32> to vector<16x128xf32>
    %124 = arith.mulf %122, %123 : vector<16x128xf32>
    %125 = vector.broadcast %104 : vector<1x128xf32> to vector<16x128xf32>
    %126 = arith.addf %124, %125 : vector<16x128xf32>
    %127 = arith.truncf %126 : vector<16x128xf32> to vector<16x128xbf16>
    %c0_39 = arith.constant 0 : index
    %c0_40 = arith.constant 0 : index
    %128 = vector.load %arg6[%c0_39, %c0_40] : memref<128x512xbf16, #tpu.memory_space<vmem>>, vector<128x512xbf16>
    %cst_41 = arith.constant dense<0.000000e+00> : vector<16x512xf32>
    %129 = tpu.matmul %127, %128, %cst_41 {dimension_numbers = #tpu.dot_dimension_numbers<[1], [0], [0], [1], [0, 0, 1, 1], [], []>} : vector<16x128xbf16>, vector<128x512xbf16>, vector<16x512xf32> -> vector<16x512xf32>
    %c0_42 = arith.constant 0 : index
    %c0_43 = arith.constant 0 : index
    %130 = vector.load %arg9[%c0_42, %c0_43] : memref<4x512xf32, #tpu.memory_space<vmem>>, vector<1x512xf32>
    %131 = vector.broadcast %130 : vector<1x512xf32> to vector<16x512xf32>
    %132 = arith.addf %129, %131 : vector<16x512xf32>
    %cst_44 = arith.constant 5.000000e-01 : f32
    %133 = vector.broadcast %cst_44 : f32 to vector<16x512xf32>
    %134 = arith.mulf %133, %132 : vector<16x512xf32>
    %cst_45 = arith.constant 0.707106769 : f32
    %135 = vector.broadcast %cst_45 : f32 to vector<16x512xf32>
    %136 = arith.mulf %132, %135 : vector<16x512xf32>
    %cst_46 = arith.constant -3.8325069 : f32
    %cst_47 = arith.constant 3.8325069 : f32
    %137 = vector.broadcast %cst_46 : f32 to vector<16x512xf32>
    %138 = arith.maximumf %137, %136 : vector<16x512xf32>
    %139 = vector.broadcast %cst_47 : f32 to vector<16x512xf32>
    %140 = arith.minimumf %139, %138 : vector<16x512xf32>
    %141 = arith.mulf %140, %140 : vector<16x512xf32>
    %cst_48 = arith.constant -2.72614237E-10 : f32
    %142 = vector.broadcast %cst_48 : f32 to vector<16x512xf32>
    %143 = arith.mulf %142, %141 : vector<16x512xf32>
    %cst_49 = arith.constant 2.77068146E-8 : f32
    %144 = vector.broadcast %cst_49 : f32 to vector<16x512xf32>
    %145 = arith.addf %143, %144 : vector<16x512xf32>
    %146 = arith.mulf %145, %141 : vector<16x512xf32>
    %cst_50 = arith.constant -2.10102394E-6 : f32
    %147 = vector.broadcast %cst_50 : f32 to vector<16x512xf32>
    %148 = arith.addf %146, %147 : vector<16x512xf32>
    %149 = arith.mulf %148, %141 : vector<16x512xf32>
    %cst_51 = arith.constant -5.69250624E-5 : f32
    %150 = vector.broadcast %cst_51 : f32 to vector<16x512xf32>
    %151 = arith.addf %149, %150 : vector<16x512xf32>
    %152 = arith.mulf %151, %141 : vector<16x512xf32>
    %cst_52 = arith.constant -7.34990637E-4 : f32
    %153 = vector.broadcast %cst_52 : f32 to vector<16x512xf32>
    %154 = arith.addf %152, %153 : vector<16x512xf32>
    %155 = arith.mulf %154, %141 : vector<16x512xf32>
    %cst_53 = arith.constant -2.954600e-03 : f32
    %156 = vector.broadcast %cst_53 : f32 to vector<16x512xf32>
    %157 = arith.addf %155, %156 : vector<16x512xf32>
    %158 = arith.mulf %157, %141 : vector<16x512xf32>
    %cst_54 = arith.constant -0.0160960332 : f32
    %159 = vector.broadcast %cst_54 : f32 to vector<16x512xf32>
    %160 = arith.addf %158, %159 : vector<16x512xf32>
    %161 = arith.mulf %160, %140 : vector<16x512xf32>
    %cst_55 = arith.constant -1.45660715E-5 : f32
    %162 = vector.broadcast %cst_55 : f32 to vector<16x512xf32>
    %163 = arith.mulf %162, %141 : vector<16x512xf32>
    %cst_56 = arith.constant -2.13374049E-4 : f32
    %164 = vector.broadcast %cst_56 : f32 to vector<16x512xf32>
    %165 = arith.addf %163, %164 : vector<16x512xf32>
    %166 = arith.mulf %165, %141 : vector<16x512xf32>
    %cst_57 = arith.constant -0.00168282702 : f32
    %167 = vector.broadcast %cst_57 : f32 to vector<16x512xf32>
    %168 = arith.addf %166, %167 : vector<16x512xf32>
    %169 = arith.mulf %168, %141 : vector<16x512xf32>
    %cst_58 = arith.constant -0.00737332925 : f32
    %170 = vector.broadcast %cst_58 : f32 to vector<16x512xf32>
    %171 = arith.addf %169, %170 : vector<16x512xf32>
    %172 = arith.mulf %171, %141 : vector<16x512xf32>
    %cst_59 = arith.constant -0.0142647391 : f32
    %173 = vector.broadcast %cst_59 : f32 to vector<16x512xf32>
    %174 = arith.addf %172, %173 : vector<16x512xf32>
    %175 = arith.divf %161, %174 : vector<16x512xf32>
    %cst_60 = arith.constant 1.000000e+00 : f32
    %176 = vector.broadcast %cst_60 : f32 to vector<16x512xf32>
    %177 = arith.addf %176, %175 : vector<16x512xf32>
    %178 = arith.mulf %134, %177 : vector<16x512xf32>
    %c1_61 = arith.constant 1 : index
    %c0_62 = arith.constant 0 : index
    %179 = vector.load %arg9[%c1_61, %c0_62] : memref<4x512xf32, #tpu.memory_space<vmem>>, vector<1x512xf32>
    %c2_63 = arith.constant 2 : index
    %c0_64 = arith.constant 0 : index
    %180 = vector.load %arg9[%c2_63, %c0_64] : memref<4x512xf32, #tpu.memory_space<vmem>>, vector<1x512xf32>
    %cst_65 = arith.constant dense<0.000000e+00> : vector<16xf32>
    %181 = vector.multi_reduction <add>, %178, %cst_65 [1] : vector<16x512xf32> to vector<16xf32>
    %182 = vector.shape_cast %181 : vector<16xf32> to vector<16x1xf32>
    %cst_66 = arith.constant 5.120000e+02 : f32
    %183 = vector.broadcast %cst_66 : f32 to vector<16x1xf32>
    %184 = arith.divf %182, %183 : vector<16x1xf32>
    %185 = vector.broadcast %184 : vector<16x1xf32> to vector<16x512xf32>
    %186 = arith.subf %178, %185 : vector<16x512xf32>
    %187 = arith.mulf %186, %186 : vector<16x512xf32>
    %cst_67 = arith.constant dense<0.000000e+00> : vector<16xf32>
    %188 = vector.multi_reduction <add>, %187, %cst_67 [1] : vector<16x512xf32> to vector<16xf32>
    %189 = vector.shape_cast %188 : vector<16xf32> to vector<16x1xf32>
    %cst_68 = arith.constant 5.120000e+02 : f32
    %190 = vector.broadcast %cst_68 : f32 to vector<16x1xf32>
    %191 = arith.divf %189, %190 : vector<16x1xf32>
    %192 = vector.broadcast %184 : vector<16x1xf32> to vector<16x512xf32>
    %193 = arith.subf %178, %192 : vector<16x512xf32>
    %cst_69 = arith.constant 9.99999974E-6 : f32
    %194 = vector.broadcast %cst_69 : f32 to vector<16x1xf32>
    %195 = arith.addf %191, %194 : vector<16x1xf32>
    %196 = math.rsqrt %195 : vector<16x1xf32>
    %197 = vector.broadcast %196 : vector<16x1xf32> to vector<16x512xf32>
    %198 = arith.mulf %193, %197 : vector<16x512xf32>
    %199 = vector.broadcast %179 : vector<1x512xf32> to vector<16x512xf32>
    %200 = arith.mulf %198, %199 : vector<16x512xf32>
    %201 = vector.broadcast %180 : vector<1x512xf32> to vector<16x512xf32>
    %202 = arith.addf %200, %201 : vector<16x512xf32>
    %203 = arith.truncf %202 : vector<16x512xf32> to vector<16x512xbf16>
    %c0_70 = arith.constant 0 : index
    %c0_71 = arith.constant 0 : index
    %204 = vector.load %arg7[%c0_70, %c0_71] : memref<512x128xbf16, #tpu.memory_space<vmem>>, vector<512x128xbf16>
    %cst_72 = arith.constant dense<0.000000e+00> : vector<16x128xf32>
    %205 = tpu.matmul %203, %204, %cst_72 {dimension_numbers = #tpu.dot_dimension_numbers<[1], [0], [0], [1], [0, 0, 1, 1], [], []>} : vector<16x512xbf16>, vector<512x128xbf16>, vector<16x128xf32> -> vector<16x128xf32>
    %c7 = arith.constant 7 : index
    %c0_73 = arith.constant 0 : index
    %206 = vector.load %arg8[%c7, %c0_73] : memref<9x128xf32, #tpu.memory_space<vmem>>, vector<1x128xf32>
    %207 = vector.broadcast %206 : vector<1x128xf32> to vector<16x128xf32>
    %208 = arith.addf %205, %207 : vector<16x128xf32>
    %c8 = arith.constant 8 : index
    %c0_74 = arith.constant 0 : index
    %209 = vector.load %arg8[%c8, %c0_74] : memref<9x128xf32, #tpu.memory_space<vmem>>, vector<1x128xf32>
    %210 = vector.broadcast %209 : vector<1x128xf32> to vector<16x128xf32>
    %211 = arith.mulf %210, %102 : vector<16x128xf32>
    %212 = arith.addf %208, %211 : vector<16x128xf32>
    %c0_75 = arith.constant 0 : index
    %c0_76 = arith.constant 0 : index
    %213 = vector.load %arg10[%c0_75, %c0_76] : memref<16x128xf32, #tpu.memory_space<vmem>>, vector<16x128xf32>
    tpu.vector_store %arg10[%c0_75, %c0_76], %212 {strides = array<i32>} : memref<16x128xf32, #tpu.memory_space<vmem>>, vector<16x128xf32>,
    return
  }
  func.func @transform_0(%arg0: i32) -> (i32, i32) {
    %c0_i32 = arith.constant 0 : i32
    %c0_i32_0 = arith.constant 0 : i32
    %c0_i32_1 = arith.constant 0 : i32
    return %c0_i32, %c0_i32_0 : i32, i32
  }
  func.func @transform_1(%arg0: i32) -> (i32, i32) {
    %c0_i32 = arith.constant 0 : i32
    %c0_i32_0 = arith.constant 0 : i32
    %c0_i32_1 = arith.constant 0 : i32
    return %c0_i32, %c0_i32_0 : i32, i32
  }
  func.func @transform_2(%arg0: i32) -> (i32, i32) {
    %c0_i32 = arith.constant 0 : i32
    %c0_i32_0 = arith.constant 0 : i32
    %c0_i32_1 = arith.constant 0 : i32
    return %c0_i32, %c0_i32_0 : i32, i32
  }
  func.func @transform_3(%arg0: i32) -> (i32, i32) {
    %c0_i32 = arith.constant 0 : i32
    %c0_i32_0 = arith.constant 0 : i32
    %c0_i32_1 = arith.constant 0 : i32
    return %c0_i32, %c0_i32_0 : i32, i32
  }
  func.func @transform_4(%arg0: i32) -> (i32, i32) {
    %c0_i32 = arith.constant 0 : i32
    %c0_i32_0 = arith.constant 0 : i32
    %c0_i32_1 = arith.constant 0 : i32
    return %c0_i32, %c0_i32_0 : i32, i32
  }
  func.func @transform_5(%arg0: i32) -> (i32, i32) {
    %c0_i32 = arith.constant 0 : i32
    %c0_i32_0 = arith.constant 0 : i32
    %c0_i32_1 = arith.constant 0 : i32
    return %c0_i32, %c0_i32_0 : i32, i32
  }
  func.func @transform_6(%arg0: i32) -> (i32, i32) {
    %c0_i32 = arith.constant 0 : i32
    %c0_i32_0 = arith.constant 0 : i32
    %c0_i32_1 = arith.constant 0 : i32
    return %c0_i32, %c0_i32_0 : i32, i32
  }
  func.func @transform_7(%arg0: i32) -> (i32, i32) {
    %c0_i32 = arith.constant 0 : i32
    %c0_i32_0 = arith.constant 0 : i32
    %c0_i32_1 = arith.constant 0 : i32
    return %c0_i32, %c0_i32_0 : i32, i32
  }
  func.func @transform_8(%arg0: i32) -> (i32, i32) {
    %c0_i32 = arith.constant 0 : i32
    %c0_i32_0 = arith.constant 0 : i32
    %c0_i32_1 = arith.constant 0 : i32
    return %c0_i32, %c0_i32_0 : i32, i32
  }
  func.func @transform_9(%arg0: i32) -> (i32, i32) {
    %c0_i32 = arith.constant 0 : i32
    %c0_i32_0 = arith.constant 0 : i32
    %c0_i32_1 = arith.constant 0 : i32
    return %c0_i32, %c0_i32_0 : i32, i32
  }
}

</mosaic_0001>

<bundles_post_ra>
// kernel: block_forward.1
= control target key start
LH: loop header
LB: loop body
LE: loop exit
PB: predicated region body
PF: predicated region fallthrough
CT: control target
= control target key end

     0   :  { %14 = vsyncpa [#allocation3], 0  ;;  %s3440_s0 = inlined_call_operand.vmem [shape: f32[16,128], index: 0, kind: input, shape index: {}]   ;;  %s3441_s1 = inlined_call_operand.vmem [shape: f32[128,128], index: 1, kind: input, shape index: {}]   ;;  %s3442_s2 = inlined_call_operand.hbm [shape: bf16[128,128], index: 2, kind: input, shape index: {}]   ;;  %s3443_s3 = inlined_call_operand.hbm [shape: bf16[128,384], index: 3, kind: input, shape index: {}]   ;;  %s3444_s4 = inlined_call_operand.hbm [shape: bf16[128,128], index: 4, kind: input, shape index: {}]   ;;  %s3445_s5 = inlined_call_operand.vmem [shape: bf16[128,512], index: 5, kind: input, shape index: {}]   ;;  %s3446_s6 = inlined_call_operand.hbm [shape: bf16[512,128], index: 6, kind: input, shape index: {}]   ;;  %s3447_s7 = inlined_call_operand.vmem [shape: f32[9,128], index: 7, kind: input, shape index: {}]   ;;  %s3448_s8 = inlined_call_operand.vmem [shape: f32[4,512], index: 8, kind: input, shape index: {}]   ;;  %s3449_s9 = inlined_call_operand.hbm [shape: f32[16,128], index: 9, kind: output, shape index: {}]  }
   0x1   :  { %15 = vsyncpa [#allocation6], 0 }
   0x2   :  { %16 = vsyncpa [#allocation9], 0 }
   0x3   :  { %17 = vsyncpa [#allocation4], 0  ;;  %s2738_s30 = smov [#allocation5]  }
   0x4   :  { %s39_s10 = sshll.u32 %s2738_s30, 4  ;;  %s40_s10 = int_to_ptr.vmem [resolvable:$true] %s39_s10 }
   0x5   :  { %s2638_s11 = scalar_lea.vmem %s40_s10, 3072  ;;  %p2643_p1 = scmp.lt.s32.totalorder %s40_s10, %s40_s10 }
   0x6   :  { %p2639_p0 = scmp.ne.s32.totalorder %s40_s10, %s2638_s11  ;;  %p2644_p2 = scmp.lt.s32.totalorder %s2638_s11, %s2638_s11 }
   0x8   :  { %p2645_p3 = por %p2644_p2, %p2643_p1 }
   0xa   :  { %p2646_p4 = pnand %p2645_p3, %p2639_p0 }
   0xc   :  { %2649 = shalt.err (!%p2646_p4)
}
   0xd   :  { %s2739_s12 = smov 192   ;;  %s2740_s13 = smov 12  }
   0xe   :  { %45 = dma.hbm_to_vmem [thread:$0]  %s3443_s3, 3072, %s40_s10, [#allocation6], %s2739_s12, %s2739_s12, %s2740_s13  }
   0xf   :  { %s2741_s16 = smov [#allocation2]  }
  0x10   :  { %s27_s17 = sshll.u32 %s2741_s16, 4  ;;  %s28_s17 = int_to_ptr.vmem [resolvable:$true] %s27_s17 }
  0x11   :  { %s2658_s18 = scalar_lea.vmem %s28_s17, 1024  ;;  %p2663_p6 = scmp.lt.s32.totalorder %s28_s17, %s28_s17 }
  0x12   :  { %p2659_p5 = scmp.ne.s32.totalorder %s28_s17, %s2658_s18  ;;  %p2664_p7 = scmp.lt.s32.totalorder %s2658_s18, %s2658_s18 }
  0x14   :  { %p2665_p8 = por %p2664_p7, %p2663_p6 }
  0x16   :  { %p2666_p9 = pnand %p2665_p8, %p2659_p5 }
  0x18   :  { %2669 = shalt.err (!%p2666_p9)
}
  0x19   :  { %s2742_s19 = smov 64   ;;  %s2743_s20 = smov 4  }
  0x1a   :  { %33 = dma.hbm_to_vmem [thread:$0]  %s3442_s2, 1024, %s28_s17, [#allocation3], %s2742_s19, %s2742_s19, %s2743_s20  }
  0x1b   :  { %s2744_s23 = smov [#allocation7]   ;;  %s2745_s25 = smov [#allocation8]  }
  0x1c   :  { %s51_s24 = sshll.u32 %s2744_s23, 4  ;;  %s65_s3 = sshll.u32 %s2745_s25, 4  ;;  %s52_s24 = int_to_ptr.vmem [resolvable:$true] %s51_s24  ;;  %s66_s3 = int_to_ptr.vmem [resolvable:$true] %s65_s3 }
  0x1d   :  { %s2678_s26 = scalar_lea.vmem %s52_s24, 1024  ;;  %p2683_p11 = scmp.lt.s32.totalorder %s52_s24, %s52_s24 }
  0x1e   :  { %p2679_p10 = scmp.ne.s32.totalorder %s52_s24, %s2678_s26  ;;  %p2684_p12 = scmp.lt.s32.totalorder %s2678_s26, %s2678_s26 }
  0x20   :  { %p2685_p13 = por %p2684_p12, %p2683_p11 }
  0x22   :  { %p2686_p0 = pnand %p2685_p13, %p2679_p10 }
  0x24   :  { %2689 = shalt.err (!%p2686_p0)
}
  0x25   :  { %57 = dma.hbm_to_vmem [thread:$0]  %s3444_s4, 1024, %s52_s24, [#allocation6], %s2742_s19, %s2742_s19, %s2743_s20  }
  0x26   :  { %s2698_s29 = scalar_lea.vmem %s66_s3, 4096  ;;  %p2703_p2 = scmp.lt.s32.totalorder %s66_s3, %s66_s3 }
  0x27   :  { %p2699_p1 = scmp.ne.s32.totalorder %s66_s3, %s2698_s29  ;;  %p2704_p3 = scmp.lt.s32.totalorder %s2698_s29, %s2698_s29 }
  0x29   :  { %p2705_p4 = por %p2704_p3, %p2703_p2 }
  0x2b   :  { %p2706_p5 = pnand %p2705_p4, %p2699_p1 }
  0x2d   :  { %2709 = shalt.err (!%p2706_p5)
}
  0x2e   :  { %71 = dma.hbm_to_vmem [thread:$0]  %s3446_s6, 4096, %s66_s3, [#allocation9], %s2742_s19, %s2742_s19, %s2743_s20  }
  0x2f   :  { %2730 = dma.done.wait [#allocation3], 1024  }
  0x30   :  { %2731 = vsyncadd [#allocation3], 4294966272 }
  0x31   :  { %2732 = dma.done.wait [#allocation6], 4096  }
  0x32   :  { %2733 = vsyncadd [#allocation6], 4294963200 }
  0x33   :  { %2734 = dma.done.wait [#allocation9], 4096  }
  0x34   :  { %2735 = vsyncadd [#allocation9], 4294963200  ;;  %v89_v0 = vld [vmem:[%s3440_s0] sm:$0xff]  ;;  %v90_v1 = vld [vmem:[%s3440_s0 + $0x8] sm:$0xff]  ;;  %v2746_v4 = vmov 0.0   ;;  %v2747_v27 = vmov 0   ;;  %v164_v53 = vlaneseq }
  0x35   :  { %93 = vadd.xlane.f32.xlu0 %v89_v0  ;;  %v2404_v2 = vld [vmem:[#allocation5 + $0xac] ss:$12 sps:$4 sm:$0xff]   ;;  %v2406_v3 = vld [vmem:[#allocation5 + $0xa8] ss:$12 sps:$4 sm:$0xff]   ;;  %2286 = vmatprep.subr.bf16.mxu1 %v2746_v4  ;;  %v2407_v5 = vld [vmem:[#allocation5 + $0xb0] ss:$12 sps:$4 sm:$0xff]  }
  0x36   :  { %307 = vmatprep.subr.bf16.mxu0 %v2404_v2  ;;  %2287 = vmatpush3.bf16.msra.mxu1 %v2407_v5  ;;  %v2408_v14 = vld [vmem:[#allocation5 + $0x94] ss:$12 sps:$4 sm:$0xff]   ;;  %v2410_v15 = vld [vmem:[#allocation5 + $0x90] ss:$12 sps:$4 sm:$0xff]   ;;  %v2411_v16 = vld [vmem:[#allocation5 + $0x98] ss:$12 sps:$4 sm:$0xff]  }
  0x37   :  { %308 = vmatpush1.bf16.msra.mxu0 %v2406_v3  ;;  %2288 = vmatprep.subr.bf16.mxu1 %v2746_v4  ;;  %v2412_v17 = vld [vmem:[#allocation5 + $0x7c] ss:$12 sps:$4 sm:$0xff]   ;;  %v2414_v18 = vld [vmem:[#allocation5 + $0x78] ss:$12 sps:$4 sm:$0xff]   ;;  %v2415_v19 = vld [vmem:[#allocation5 + $0x80] ss:$12 sps:$4 sm:$0xff]  }
  0x38   :  { %309 = vmatprep.subr.bf16.mxu0 %v2408_v14  ;;  %v2416_v20 = vld [vmem:[#allocation5 + $0x64] ss:$12 sps:$4 sm:$0xff]   ;;  %v2418_v21 = vld [vmem:[#allocation5 + $0x60] ss:$12 sps:$4 sm:$0xff]   ;;  %v2419_v22 = vld [vmem:[#allocation5 + $0x68] ss:$12 sps:$4 sm:$0xff]   ;;  %339 = vmatprep.mubr.bf16.mxu0 %v2747_v27 }
  0x39   :  { %95 = vadd.xlane.f32.xlu0 %v90_v1  ;;  %v2420_v23 = vld [vmem:[#allocation5 + $0x4c] ss:$12 sps:$4 sm:$0xff]   ;;  %v2422_v24 = vld [vmem:[#allocation5 + $0x48] ss:$12 sps:$4 sm:$0xff]   ;;  %v2423_v25 = vld [vmem:[#allocation5 + $0x50] ss:$12 sps:$4 sm:$0xff]  }
  0x3a   :  { %2289 = vmatpush3.bf16.msra.mxu1 %v2411_v16  ;;  %v2424_v26 = vld [vmem:[#allocation5 + $0x34] ss:$12 sps:$4 sm:$0xff]   ;;  %vm2748_vm0 = vmmov 0   ;;  %v2426_v28 = vld [vmem:[#allocation5 + $0x30] ss:$12 sps:$4 sm:$0xff]   ;;  %v2847_v54 = vshrl.u32 %v164_v53, 7 }
  0x3b   :  { %310 = vmatpush1.bf16.msra.mxu0 %v2410_v15  ;;  %2290 = vmatprep.subr.bf16.mxu1 %v2746_v4  ;;  %v2427_v29 = vld [vmem:[#allocation5 + $0x38] ss:$12 sps:$4 sm:$0xff]   ;;  %v2428_v30 = vld [vmem:[#allocation5 + $0x1c] ss:$12 sps:$4 sm:$0xff]   ;;  %v2431_v32 = vld [vmem:[#allocation5 + $0x20] ss:$12 sps:$4 sm:$0xff]  }
  0x3c   :  { %311 = vmatprep.subr.bf16.mxu0 %v2412_v17  ;;  %2302 = vmatprep.mubr.msk.bf16.mxu1 %vm2748_vm0, %v2746_v4  ;;  %v2430_v31 = vld [vmem:[#allocation5 + $0x18] ss:$12 sps:$4 sm:$0xff]   ;;  %v2434_v34 = vld [vmem:[#allocation5] ss:$12 sps:$4 sm:$0xff]   ;;  %v2435_v35 = vld [vmem:[#allocation5 + $0x8] ss:$12 sps:$4 sm:$0xff]  }
  0x3d   :  { %v2432_v33 = vld [vmem:[#allocation5 + $0x4] ss:$12 sps:$4 sm:$0xff]   ;;  %v2068_v44 = vld [vmem:[%s3447_s7] ss:$0 sm:$0xff]  ;;  %v2069_v48 = vld [vmem:[%s3447_s7 + $0x1] ss:$0 sm:$0xff] }
  0x3e   :  { %2291 = vmatpush3.bf16.msra.mxu1 %v2415_v19  ;;  %v2850_v55 = vsub.s32 0, %v2847_v54  ;;  %v2853_v56 = vsub.s32 2, %v2847_v54  ;;  %v2070_v57 = vld [vmem:[%s3448_s8 + $0x3] ss:$4 sm:$0x7]  ;;  %v2859_v58 = vsub.s32 1, %v2847_v54 }
  0x3f   :  { %312 = vmatpush1.bf16.msra.mxu0 %v2414_v18  ;;  %2292 = vmatprep.subr.bf16.mxu1 %v2746_v4  ;;  %v2437_v16 = vld [vmem:[#allocation2 + $0x30] sm:$0xff]   ;;  %v478_v53 = vld [vmem:[%s3441_s1 + $0x20] sm:$0xff]  ;;  %s2749_s28 = smov [#allocation10]  }
  0x40   :  { %313 = vmatprep.subr.bf16.mxu0 %v2416_v20  ;;  %v167_v61 = vrot.slane %v2070_v57, %v2850_v55  ;;  %v175_v62 = vrot.slane %v2070_v57, %v2853_v56  ;;  %s2054_s29 = sshll.u32 %s2749_s28, 4  ;;  %s2055_s29 = int_to_ptr.vmem [resolvable:$true] %s2054_s29 }
  0x41   :  { %p2715_p7 = scmp.lt.s32.totalorder %s2055_s29, %s2055_s29 }
  0x42   :  { %2293 = vmatpush3.bf16.msra.mxu1 %v2419_v22 }
  0x43   :  { %314 = vmatpush1.bf16.msra.mxu0 %v2418_v21  ;;  %2294 = vmatprep.subr.bf16.mxu1 %v2746_v4  ;;  %v2438_v21 = vld [vmem:[#allocation2 + $0x28] sm:$0xff]  }
  0x44   :  { %315 = vmatprep.subr.bf16.mxu0 %v2420_v23 }
  0x46   :  { %2295 = vmatpush3.bf16.msra.mxu1 %v2423_v25 }
  0x47   :  { %316 = vmatpush1.bf16.msra.mxu0 %v2422_v24  ;;  %2296 = vmatprep.subr.bf16.mxu1 %v2746_v4  ;;  %v2439_v24 = vld [vmem:[#allocation2 + $0x20] sm:$0xff]  }
  0x48   :  { %317 = vmatprep.subr.bf16.mxu0 %v2424_v26  ;;  %v2440_v26 = vld [vmem:[#allocation2 + $0x18] sm:$0xff]  }
  0x4a   :  { %2297 = vmatpush3.bf16.msra.mxu1 %v2427_v29 }
  0x4b   :  { %318 = vmatpush1.bf16.msra.mxu0 %v2426_v28  ;;  %2298 = vmatprep.subr.bf16.mxu1 %v2746_v4 }
  0x4c   :  { %319 = vmatprep.subr.bf16.mxu0 %v2428_v30  ;;  %v2441_v30 = vld [vmem:[#allocation2 + $0x10] sm:$0xff]  }
  0x4e   :  { %2299 = vmatpush3.bf16.msra.mxu1 %v2431_v32  ;;  %v2442_v32 = vld [vmem:[#allocation2 + $0x8] sm:$0xff]  }
  0x4f   :  { %320 = vmatpush1.bf16.msra.mxu0 %v2430_v31  ;;  %2300 = vmatprep.subr.bf16.mxu1 %v2746_v4 }
  0x50   :  { %321 = vmatprep.subr.bf16.mxu0 %v2432_v33 }
  0x52   :  { %2301 = vmatpush3.bf16.msra.mxu1 %v2435_v35  ;;  %v2443_v35 = vld [vmem:[#allocation2] sm:$0xff]  }
  0x53   :  { %322 = vmatpush1.bf16.msra.mxu0 %v2434_v34 }
  0xbe   :  { %v94_v6 = vpop.xlane.xlu0 %93 }
  0xbf   :  { %v98_v7 = vmul.f32 0.0078125, %v94_v6 }
  0xc1   :  { %v2822_v8 = vsub.f32 %v89_v0, %v98_v7 }
  0xc2   :  { %v96_v9 = vpop.xlane.xlu0 %95 }
  0xc3   :  { %v99_v10 = vmul.f32 0.0078125, %v96_v9  ;;  %v102_v11 = vmul.f32 %v2822_v8, %v2822_v8  ;;  %v2436_v9 = vld [vmem:[#allocation2 + $0x38] sm:$0xff]  }
  0xc5   :  { %v2826_v12 = vsub.f32 %v90_v1, %v99_v10  ;;  %104 = vadd.xlane.f32.xlu1 %v102_v11  ;;  %v171_v1 = vrot.slane %v2070_v57, %v2859_v58 }
  0xc7   :  { %v103_v13 = vmul.f32 %v2826_v12, %v2826_v12 }
  0xc9   :  { %106 = vadd.xlane.f32.xlu1 %v103_v13 }
 0x14e   :  { %v105_v36 = vpop.xlane.xlu1 %104 }
 0x14f   :  { %v108_v37 = vmul.f32 0.0078125, %v105_v36 }
 0x151   :  { %v110_v38 = vadd.f32 1e-05, %v108_v37 }
 0x152   :  { %v107_v39 = vpop.xlane.xlu1 %106 }
 0x153   :  { %2532 = vrsqrt.f32 %v110_v38  ;;  %v109_v40 = vmul.f32 0.0078125, %v107_v39 }
 0x155   :  { %v111_v41 = vadd.f32 1e-05, %v109_v40 }
 0x157   :  { %2534 = vrsqrt.f32 %v111_v41 }
 0x160   :  { %v2533_v42 = vpop.eup %2532 }
 0x161   :  { %v114_v43 = vmul.f32 %v2533_v42, %v2822_v8  ;;  %v474_v42 = vld [vmem:[%s3441_s1] sm:$0xff] }
 0x163   :  { %v120_v47 = vmul.f32 %v2068_v44, %v114_v43 }
 0x164   :  { %v2535_v45 = vpop.eup %2534 }
 0x165   :  { %v115_v46 = vmul.f32 %v2535_v45, %v2826_v12  ;;  %v126_v50 = vadd.f32 %v2069_v48, %v120_v47  ;;  %v476_v45 = vld [vmem:[%s3441_s1 + $0x10] sm:$0xff]  ;;  %v475_v47 = vld [vmem:[%s3441_s1 + $0x8] sm:$0xff] }
 0x167   :  { %v121_v49 = vmul.f32 %v2068_v44, %v115_v46 }
 0x169   :  { %v127_v51 = vadd.f32 %v2069_v48, %v121_v49 }
 0x16b   :  { %v128_v52 = vpack.c.bf16 %v127_v51, %v126_v50  ;;  %v477_v51 = vld [vmem:[%s3441_s1 + $0x18] sm:$0xff] }
 0x16d   :  { %340 = vmatmul.mubr.bf16.vlgmr.msra.gmra.mxu0 %v128_v52  ;;  %2303 = vmatmul.mubr.bf16.vlgmr.msra.gmra.mxu1 %v128_v52 }
 0x22d   :  { %v341_v59 = vpop.f32.mrf.mxu0  ;;  %v384_v60 = vpop.f32.mrf.mxu1 }
 0x22e   :  { %v342_v5 = vadd.f32 %v341_v59, %v167_v61  ;;  %v385_v6 = vadd.f32 %v384_v60, %v175_v62 }
 0x22f   :  { %v343_v63 = vpop.f32.mrf.mxu0  ;;  %v2304_v0 = vpop.f32.mrf.mxu1 }
 0x230   :  { %v344_v12 = vadd.f32 %v343_v63, %v171_v1  ;;  %v479_v63 = vld [vmem:[%s3441_s1 + $0x28] sm:$0xff] }
 0x231   :  { %v345_v2 = vpop.f32.mrf.mxu0  ;;  %v387_v3 = vpop.f32.mrf.mxu1 }
 0x232   :  { %v346_v7 = vadd.f32 %v345_v2, %v167_v61  ;;  %v388_v8 = vadd.f32 %v387_v3, %v175_v62  ;;  %v480_v61 = vld [vmem:[%s3441_s1 + $0x30] sm:$0xff]  ;;  %v481_v3 = vld [vmem:[%s3441_s1 + $0x38] sm:$0xff] }
 0x233   :  { %v347_v10 = vpop.f32.mrf.mxu0  ;;  %v2305_v11 = vpop.f32.mrf.mxu1 }
 0x234   :  { %v2864_v13 = vpack.c.bf16 %v346_v7, %v342_v5  ;;  %v409_v14 = vpack.c.bf16 %v388_v8, %v385_v6  ;;  %v348_v15 = vadd.f32 %v347_v10, %v171_v1  ;;  %v482_v6 = vld [vmem:[%s3441_s1 + $0x40] sm:$0xff]  ;;  %v484_v10 = vld [vmem:[%s3441_s1 + $0x50] sm:$0xff] }
 0x236   :  { %v408_v17 = vpack.c.bf16 %v348_v15, %v344_v12  ;;  %2322 = vmatprep.mubr.bf16.mxu0 %v2864_v13  ;;  %v473_v18 = vmul.bf16 %v2436_v9, %v409_v14  ;;  %v472_v20 = vmul.bf16 %v2437_v16, %v409_v14  ;;  %v471_v23 = vmul.bf16 %v2438_v21, %v409_v14  ;;  %v483_v12 = vld [vmem:[%s3441_s1 + $0x48] sm:$0xff] }
 0x237   :  { %v470_v25 = vmul.bf16 %v2439_v24, %v409_v14  ;;  %v469_v29 = vmul.bf16 %v2440_v26, %v409_v14  ;;  %v468_v31 = vmul.bf16 %v2441_v30, %v409_v14  ;;  %v467_v34 = vmul.bf16 %v2442_v32, %v409_v14 }
 0x238   :  { %2338 = vmatprep.subr.bf16.mxu1 %v473_v18  ;;  %v465_v19 = vmul.bf16 %v2436_v9, %v408_v17  ;;  %v464_v22 = vmul.bf16 %v2437_v16, %v408_v17  ;;  %v463_v28 = vmul.bf16 %v2438_v21, %v408_v17  ;;  %v462_v33 = vmul.bf16 %v2439_v24, %v408_v17  ;;  %v485_v16 = vld [vmem:[%s3441_s1 + $0x58] sm:$0xff]  ;;  %v487_v24 = vld [vmem:[%s3441_s1 + $0x68] sm:$0xff] }
 0x239   :  { %2339 = vmatpush3.bf16.msra.mxu1 %v473_v18  ;;  %v466_v36 = vmul.bf16 %v2443_v35, %v409_v14  ;;  %v461_v37 = vmul.bf16 %v2440_v26, %v408_v17  ;;  %v460_v38 = vmul.bf16 %v2441_v30, %v408_v17  ;;  %v459_v39 = vmul.bf16 %v2442_v32, %v408_v17  ;;  %v486_v18 = vld [vmem:[%s3441_s1 + $0x60] sm:$0xff] }
 0x23a   :  { %2306 = vmatprep.subr.bf16.mxu0 %v465_v19  ;;  %2340 = vmatprep.subr.bf16.mxu1 %v472_v20  ;;  %v458_v40 = vmul.bf16 %v2443_v35, %v408_v17 }
 0x23b   :  { %2307 = vmatpush3.bf16.xpose.msra.mxu0 %v465_v19 }
 0x23c   :  { %2308 = vmatprep.subr.bf16.mxu0 %v464_v22 }
 0x23d   :  { %2341 = vmatpush3.bf16.msra.mxu1 %v472_v20 }
 0x23e   :  { %2342 = vmatprep.subr.bf16.mxu1 %v471_v23 }
 0x241   :  { %2343 = vmatpush3.bf16.msra.mxu1 %v471_v23 }
 0x242   :  { %2344 = vmatprep.subr.bf16.mxu1 %v470_v25 }
 0x243   :  { %2309 = vmatpush3.bf16.xpose.msra.mxu0 %v464_v22  ;;  %v488_v22 = vld [vmem:[%s3441_s1 + $0x70] sm:$0xff] }
 0x244   :  { %2310 = vmatprep.subr.bf16.mxu0 %v463_v28 }
 0x245   :  { %2345 = vmatpush3.bf16.msra.mxu1 %v470_v25 }
 0x246   :  { %2346 = vmatprep.subr.bf16.mxu1 %v469_v29 }
 0x249   :  { %2347 = vmatpush3.bf16.msra.mxu1 %v469_v29  ;;  %v489_v29 = vld [vmem:[%s3441_s1 + $0x78] sm:$0xff] }
 0x24a   :  { %2348 = vmatprep.subr.bf16.mxu1 %v468_v31 }
 0x24b   :  { %2311 = vmatpush3.bf16.xpose.msra.mxu0 %v463_v28 }
 0x24c   :  { %2312 = vmatprep.subr.bf16.mxu0 %v462_v33 }
 0x24d   :  { %2349 = vmatpush3.bf16.msra.mxu1 %v468_v31 }
 0x24e   :  { %2350 = vmatprep.subr.bf16.mxu1 %v467_v34 }
 0x251   :  { %2351 = vmatpush3.bf16.msra.mxu1 %v467_v34 }
 0x252   :  { %2352 = vmatprep.subr.bf16.mxu1 %v466_v36 }
 0x253   :  { %2313 = vmatpush3.bf16.xpose.msra.mxu0 %v462_v33 }
 0x254   :  { %2314 = vmatprep.subr.bf16.mxu0 %v461_v37 }
 0x255   :  { %2353 = vmatpush3.bf16.msra.mxu1 %v466_v36 }
 0x256   :  { %2370 = vmatprep.subr.bf16.mxu1 %v2746_v4 }
 0x25b   :  { %2315 = vmatpush3.bf16.xpose.msra.mxu0 %v461_v37 }
 0x25c   :  { %2316 = vmatprep.subr.bf16.mxu0 %v460_v38 }
 0x263   :  { %2317 = vmatpush3.bf16.xpose.msra.mxu0 %v460_v38 }
 0x264   :  { %2318 = vmatprep.subr.bf16.mxu0 %v459_v39 }
 0x26b   :  { %2319 = vmatpush3.bf16.xpose.msra.mxu0 %v459_v39 }
 0x26c   :  { %2320 = vmatprep.subr.bf16.mxu0 %v458_v40 }
 0x273   :  { %2321 = vmatpush3.bf16.xpose.msra.mxu0 %v458_v40 }
 0x27a   :  { %2323 = vmatmul.mubr.bf16.vlgmr.msra.gmra.mxu0 %v2864_v13 }
 0x27b   :  { %2326 = vmatprep.mubr.bf16.mxu0 %v2864_v13 }
 0x282   :  { %2327 = vmatmul.mubr.bf16.gmra.mxu0 %v2864_v13 }
 0x283   :  { %2330 = vmatprep.mubr.bf16.mxu0 %v2864_v13 }
 0x28a   :  { %2331 = vmatmul.mubr.bf16.gmra.mxu0 %v2864_v13 }
 0x28b   :  { %2334 = vmatprep.mubr.bf16.mxu0 %v2864_v13 }
 0x292   :  { %2335 = vmatmul.mubr.bf16.gmra.mxu0 %v2864_v13 }
 0x293   :  { %1282 = vmatprep.mubr.bf16.mxu0 %v2747_v27 }
 0x33a   :  { %v2324_v41 = vpop.f32.mrf.mxu0 }
 0x33b   :  { %v2888_v49 = vadd.f32 %v2324_v41, %v476_v45 }
 0x33c   :  { %v524_v43 = vpop.f32.mrf.mxu0 }
 0x33d   :  { %v2879_v44 = vadd.f32 %v524_v43, %v474_v42 }
 0x33e   :  { %v2325_v46 = vpop.f32.mrf.mxu0 }
 0x33f   :  { %587 = vmax.xlane.f32.xlu0 %v2879_v44  ;;  %v2897_v59 = vadd.f32 %v2325_v46, %v477_v51 }
 0x340   :  { %v527_v48 = vpop.f32.mrf.mxu0 }
 0x341   :  { %v528_v50 = vadd.f32 %v527_v48, %v475_v47 }
 0x342   :  { %v2328_v52 = vpop.f32.mrf.mxu0 }
 0x343   :  { %589 = vmax.xlane.f32.xlu1 %v528_v50  ;;  %591 = vmax.xlane.f32.xlu0 %v2888_v49  ;;  %v2909_v1 = vadd.f32 %v2328_v52, %v480_v61 }
 0x344   :  { %v540_v57 = vpop.f32.mrf.mxu0 }
 0x345   :  { %v2899_v60 = vadd.f32 %v540_v57, %v478_v53 }
 0x346   :  { %v2329_v62 = vpop.f32.mrf.mxu0 }
 0x347   :  { %593 = vmax.xlane.f32.xlu1 %v2897_v59  ;;  %595 = vmax.xlane.f32.xlu0 %v2899_v60  ;;  %v2918_v8 = vadd.f32 %v2329_v62, %v481_v3 }
 0x348   :  { %v543_v0 = vpop.f32.mrf.mxu0 }
 0x349   :  { %v544_v2 = vadd.f32 %v543_v0, %v479_v63 }
 0x34a   :  { %v2332_v5 = vpop.f32.mrf.mxu0 }
 0x34b   :  { %597 = vmax.xlane.f32.xlu1 %v544_v2  ;;  %599 = vmax.xlane.f32.xlu0 %v2909_v1  ;;  %v2930_v14 = vadd.f32 %v2332_v5, %v484_v10 }
 0x34c   :  { %v556_v7 = vpop.f32.mrf.mxu0 }
 0x34d   :  { %v2920_v9 = vadd.f32 %v556_v7, %v482_v6 }
 0x34e   :  { %v2333_v11 = vpop.f32.mrf.mxu0 }
 0x34f   :  { %601 = vmax.xlane.f32.xlu1 %v2918_v8  ;;  %603 = vmax.xlane.f32.xlu0 %v2920_v9  ;;  %v2942_v20 = vadd.f32 %v2333_v11, %v485_v16 }
 0x350   :  { %v559_v13 = vpop.f32.mrf.mxu0 }
 0x351   :  { %v2932_v15 = vadd.f32 %v559_v13, %v483_v12 }
 0x352   :  { %v2336_v17 = vpop.f32.mrf.mxu0 }
 0x353   :  { %605 = vmax.xlane.f32.xlu1 %v2932_v15  ;;  %607 = vmax.xlane.f32.xlu0 %v2930_v14  ;;  %v2954_v26 = vadd.f32 %v2336_v17, %v488_v22 }
 0x354   :  { %v572_v19 = vpop.f32.mrf.mxu0 }
 0x355   :  { %v2944_v21 = vadd.f32 %v572_v19, %v486_v18 }
 0x356   :  { %v2337_v23 = vpop.f32.mrf.mxu0 }
 0x357   :  { %609 = vmax.xlane.f32.xlu1 %v2942_v20  ;;  %611 = vmax.xlane.f32.xlu0 %v2944_v21  ;;  %v2963_v30 = vadd.f32 %v2337_v23, %v489_v29 }
 0x358   :  { %v575_v25 = vpop.f32.mrf.mxu0 }
 0x359   :  { %v2956_v28 = vadd.f32 %v575_v25, %v487_v24 }
 0x35b   :  { %613 = vmax.xlane.f32.xlu1 %v2956_v28  ;;  %615 = vmax.xlane.f32.xlu0 %v2954_v26 }
 0x35f   :  { %617 = vmax.xlane.f32.xlu1 %v2963_v30 }
 0x3c8   :  { %v588_v31 = vpop.xlane.xlu0 %587 }
 0x3c9   :  { %v619_v32 = vsub.f32 %v2879_v44, %v588_v31 }
 0x3cb   :  { %v635_v33 = vmul.f32 1.442695, %v619_v32 }
 0x3cc   :  { %v590_v34 = vpop.xlane.xlu1 %589  ;;  %v592_v35 = vpop.xlane.xlu0 %591 }
 0x3cd   :  { %2536 = vpow2.f32 %v635_v33  ;;  %v620_v36 = vsub.f32 %v528_v50, %v590_v34  ;;  %v621_v37 = vsub.f32 %v2888_v49, %v592_v35 }
 0x3cf   :  { %v637_v38 = vmul.f32 1.442695, %v620_v36  ;;  %v639_v39 = vmul.f32 1.442695, %v621_v37 }
 0x3d0   :  { %v594_v40 = vpop.xlane.xlu1 %593  ;;  %v596_v41 = vpop.xlane.xlu0 %595 }
 0x3d1   :  { %2538 = vpow2.f32 %v637_v38  ;;  %v622_v42 = vsub.f32 %v2897_v59, %v594_v40  ;;  %v623_v43 = vsub.f32 %v2899_v60, %v596_v41 }
 0x3d2   :  { %2540 = vpow2.f32 %v639_v39 }
 0x3d3   :  { %v641_v45 = vmul.f32 1.442695, %v622_v42  ;;  %v643_v46 = vmul.f32 1.442695, %v623_v43 }
 0x3d4   :  { %v598_v44 = vpop.xlane.xlu1 %597  ;;  %v600_v47 = vpop.xlane.xlu0 %599 }
 0x3d5   :  { %2542 = vpow2.f32 %v641_v45  ;;  %v624_v48 = vsub.f32 %v544_v2, %v598_v44  ;;  %v625_v50 = vsub.f32 %v2909_v1, %v600_v47 }
 0x3d6   :  { %2544 = vpow2.f32 %v643_v46 }
 0x3d7   :  { %v645_v49 = vmul.f32 1.442695, %v624_v48  ;;  %v647_v51 = vmul.f32 1.442695, %v625_v50 }
 0x3d8   :  { %v602_v52 = vpop.xlane.xlu1 %601  ;;  %v604_v53 = vpop.xlane.xlu0 %603 }
 0x3d9   :  { %2546 = vpow2.f32 %v645_v49  ;;  %v626_v57 = vsub.f32 %v2918_v8, %v602_v52  ;;  %v627_v59 = vsub.f32 %v2920_v9, %v604_v53 }
 0x3da   :  { %v2973_v60 = vpop.eup %2536  ;;  %2548 = vpow2.f32 %v647_v51 }
 0x3db   :  { %v649_v61 = vmul.f32 1.442695, %v626_v57  ;;  %v651_v62 = vmul.f32 1.442695, %v627_v59  ;;  %667 = vadd.xlane.f32.xlu0 %v2973_v60 }
 0x3dc   :  { %v606_v63 = vpop.xlane.xlu1 %605  ;;  %v608_v0 = vpop.xlane.xlu0 %607 }
 0x3dd   :  { %2550 = vpow2.f32 %v649_v61  ;;  %v628_v1 = vsub.f32 %v2932_v15, %v606_v63  ;;  %v629_v2 = vsub.f32 %v2930_v14, %v608_v0 }
 0x3de   :  { %v2978_v3 = vpop.eup %2538  ;;  %2552 = vpow2.f32 %v651_v62 }
 0x3df   :  { %v2980_v5 = vpop.eup %2540  ;;  %v653_v6 = vmul.f32 1.442695, %v628_v1  ;;  %v655_v7 = vmul.f32 1.442695, %v629_v2  ;;  %669 = vadd.xlane.f32.xlu1 %v2978_v3 }
 0x3e0   :  { %671 = vadd.xlane.f32.xlu0 %v2980_v5  ;;  %v610_v8 = vpop.xlane.xlu1 %609  ;;  %v612_v9 = vpop.xlane.xlu0 %611 }
 0x3e1   :  { %2554 = vpow2.f32 %v653_v6  ;;  %v630_v10 = vsub.f32 %v2942_v20, %v610_v8  ;;  %v631_v11 = vsub.f32 %v2944_v21, %v612_v9 }
 0x3e2   :  { %v2986_v12 = vpop.eup %2542  ;;  %2556 = vpow2.f32 %v655_v7 }
 0x3e3   :  { %v2988_v13 = vpop.eup %2544  ;;  %v657_v14 = vmul.f32 1.442695, %v630_v10  ;;  %v659_v15 = vmul.f32 1.442695, %v631_v11  ;;  %673 = vadd.xlane.f32.xlu1 %v2986_v12 }
 0x3e4   :  { %675 = vadd.xlane.f32.xlu0 %v2988_v13  ;;  %v614_v16 = vpop.xlane.xlu1 %613  ;;  %v616_v17 = vpop.xlane.xlu0 %615 }
 0x3e5   :  { %2558 = vpow2.f32 %v657_v14  ;;  %v632_v18 = vsub.f32 %v2956_v28, %v614_v16  ;;  %v633_v19 = vsub.f32 %v2954_v26, %v616_v17 }
 0x3e6   :  { %v2994_v20 = vpop.eup %2546  ;;  %2560 = vpow2.f32 %v659_v15 }
 0x3e7   :  { %v2996_v21 = vpop.eup %2548  ;;  %v661_v22 = vmul.f32 1.442695, %v632_v18  ;;  %v663_v23 = vmul.f32 1.442695, %v633_v19  ;;  %677 = vadd.xlane.f32.xlu1 %v2994_v20 }
 0x3e8   :  { %679 = vadd.xlane.f32.xlu0 %v2996_v21  ;;  %v618_v24 = vpop.xlane.xlu1 %617 }
 0x3e9   :  { %2562 = vpow2.f32 %v661_v22  ;;  %v634_v25 = vsub.f32 %v2963_v30, %v618_v24 }
 0x3ea   :  { %v3001_v29 = vpop.eup %2550  ;;  %2564 = vpow2.f32 %v663_v23 }
 0x3eb   :  { %v3003_v28 = vpop.eup %2552  ;;  %v665_v26 = vmul.f32 1.442695, %v634_v25  ;;  %681 = vadd.xlane.f32.xlu1 %v3001_v29 }
 0x3ec   :  { %683 = vadd.xlane.f32.xlu0 %v3003_v28 }
 0x3ed   :  { %2566 = vpow2.f32 %v665_v26 }
 0x3ee   :  { %v3007_v31 = vpop.eup %2554 }
 0x3ef   :  { %v3009_v32 = vpop.eup %2556  ;;  %685 = vadd.xlane.f32.xlu1 %v3007_v31 }
 0x3f0   :  { %687 = vadd.xlane.f32.xlu0 %v3009_v32 }
 0x3f2   :  { %v3013_v30 = vpop.eup %2558 }
 0x3f3   :  { %v3015_v33 = vpop.eup %2560  ;;  %689 = vadd.xlane.f32.xlu1 %v3013_v30 }
 0x3f4   :  { %691 = vadd.xlane.f32.xlu0 %v3015_v33 }
 0x3f6   :  { %v3019_v34 = vpop.eup %2562 }
 0x3f7   :  { %v3021_v35 = vpop.eup %2564  ;;  %693 = vadd.xlane.f32.xlu1 %v3019_v34 }
 0x3f8   :  { %695 = vadd.xlane.f32.xlu0 %v3021_v35 }
 0x3fa   :  { %v3025_v36 = vpop.eup %2566 }
 0x3fb   :  { %697 = vadd.xlane.f32.xlu1 %v3025_v36 }
 0x464   :  { %v668_v37 = vpop.xlane.xlu0 %667 }
 0x465   :  { %2568 = vrcp.f32 %v668_v37 }
 0x468   :  { %v670_v38 = vpop.xlane.xlu1 %669 }
 0x469   :  { %2570 = vrcp.f32 %v670_v38  ;;  %v672_v39 = vpop.xlane.xlu0 %671 }
 0x46a   :  { %2572 = vrcp.f32 %v672_v39 }
 0x46c   :  { %v674_v40 = vpop.xlane.xlu1 %673 }
 0x46d   :  { %2574 = vrcp.f32 %v674_v40  ;;  %v676_v41 = vpop.xlane.xlu0 %675 }
 0x46e   :  { %2576 = vrcp.f32 %v676_v41  ;;  %v2450_v41 = vld [vmem:[#allocation7 + $0x8] sm:$0xff]  }
 0x470   :  { %v678_v42 = vpop.xlane.xlu1 %677 }
 0x471   :  { %2578 = vrcp.f32 %v678_v42  ;;  %v680_v43 = vpop.xlane.xlu0 %679  ;;  %v2451_v42 = vld [vmem:[#allocation7] sm:$0xff]  }
 0x472   :  { %2580 = vrcp.f32 %v680_v43  ;;  %v2569_v45 = vpop.eup %2568 }
 0x473   :  { %v700_v48 = vmul.f32 %v2569_v45, %v2973_v60 }
 0x474   :  { %v682_v46 = vpop.xlane.xlu1 %681 }
 0x475   :  { %2582 = vrcp.f32 %v682_v46  ;;  %v684_v44 = vpop.xlane.xlu0 %683 }
 0x476   :  { %v2571_v47 = vpop.eup %2570  ;;  %2584 = vrcp.f32 %v684_v44 }
 0x477   :  { %v702_v50 = vmul.f32 %v2571_v47, %v2978_v3  ;;  %v2573_v49 = vpop.eup %2572 }
 0x478   :  { %v686_v51 = vpop.xlane.xlu1 %685  ;;  %v704_v59 = vmul.f32 %v2573_v49, %v2980_v5 }
 0x479   :  { %2586 = vrcp.f32 %v686_v51  ;;  %v688_v52 = vpop.xlane.xlu0 %687  ;;  %v731_v53 = vpack.c.bf16 %v702_v50, %v700_v48 }
 0x47a   :  { %v2575_v57 = vpop.eup %2574  ;;  %2588 = vrcp.f32 %v688_v52 }
 0x47b   :  { %2354 = vmatprep.mubr.bf16.mxu1 %v731_v53  ;;  %v706_v61 = vmul.f32 %v2575_v57, %v2986_v12  ;;  %v2577_v62 = vpop.eup %2576 }
 0x47c   :  { %v690_v63 = vpop.xlane.xlu1 %689  ;;  %v708_v2 = vmul.f32 %v2577_v62, %v2988_v13 }
 0x47d   :  { %2590 = vrcp.f32 %v690_v63  ;;  %v692_v0 = vpop.xlane.xlu0 %691  ;;  %v732_v1 = vpack.c.bf16 %v706_v61, %v704_v59 }
 0x47e   :  { %v2579_v60 = vpop.eup %2578  ;;  %2592 = vrcp.f32 %v692_v0 }
 0x47f   :  { %2355 = vmatmul.mubr.bf16.vlgmr.msra.gmra.mxu1 %v732_v1  ;;  %v710_v3 = vmul.f32 %v2579_v60, %v2994_v20  ;;  %v2581_v6 = vpop.eup %2580 }
 0x480   :  { %v694_v7 = vpop.xlane.xlu1 %693  ;;  %v712_v10 = vmul.f32 %v2581_v6, %v2996_v21 }
 0x481   :  { %2594 = vrcp.f32 %v694_v7  ;;  %v696_v8 = vpop.xlane.xlu0 %695  ;;  %v733_v9 = vpack.c.bf16 %v710_v3, %v708_v2 }
 0x482   :  { %v2583_v5 = vpop.eup %2582  ;;  %2596 = vrcp.f32 %v696_v8 }
 0x483   :  { %2358 = vmatprep.mubr.bf16.mxu1 %v733_v9  ;;  %v714_v11 = vmul.f32 %v2583_v5, %v3001_v29  ;;  %v2585_v12 = vpop.eup %2584 }
 0x484   :  { %v698_v14 = vpop.xlane.xlu1 %697  ;;  %v716_v13 = vmul.f32 %v2585_v12, %v3003_v28 }
 0x485   :  { %2598 = vrcp.f32 %v698_v14  ;;  %v734_v15 = vpack.c.bf16 %v714_v11, %v712_v10 }
 0x486   :  { %v2587_v16 = vpop.eup %2586 }
 0x487   :  { %2359 = vmatmul.mubr.bf16.gmra.mxu1 %v734_v15  ;;  %v718_v17 = vmul.f32 %v2587_v16, %v3007_v31  ;;  %v2589_v18 = vpop.eup %2588  ;;  %v2103_v15 = vld [vmem:[%s3447_s7 + $0x6] ss:$0 sm:$0xff] }
 0x488   :  { %v720_v22 = vmul.f32 %v2589_v18, %v3009_v32  ;;  %v2444_v32 = vld [vmem:[#allocation7 + $0x38] sm:$0xff]  }
 0x489   :  { %v735_v19 = vpack.c.bf16 %v718_v17, %v716_v13  ;;  %2371 = vmatpush3.bf16.msra.mxu1 %v2444_v32 }
 0x48a   :  { %v2591_v20 = vpop.eup %2590  ;;  %2372 = vmatprep.subr.bf16.mxu1 %v2746_v4 }
 0x48b   :  { %2362 = vmatprep.mubr.bf16.mxu1 %v735_v19  ;;  %v722_v21 = vmul.f32 %v2591_v20, %v3013_v30  ;;  %v2593_v23 = vpop.eup %2592  ;;  %v2445_v30 = vld [vmem:[#allocation7 + $0x30] sm:$0xff]  }
 0x48c   :  { %v724_v29 = vmul.f32 %v2593_v23, %v3015_v33  ;;  %v2446_v33 = vld [vmem:[#allocation7 + $0x28] sm:$0xff]  }
 0x48d   :  { %v736_v24 = vpack.c.bf16 %v722_v21, %v720_v22  ;;  %2373 = vmatpush3.bf16.msra.mxu1 %v2445_v30  ;;  %v2112_v30 = vld [vmem:[%s3447_s7 + $0x2] ss:$0 sm:$0xff] }
 0x48e   :  { %v2595_v25 = vpop.eup %2594  ;;  %2374 = vmatprep.subr.bf16.mxu1 %v2746_v4 }
 0x48f   :  { %2363 = vmatmul.mubr.bf16.gmra.mxu1 %v736_v24  ;;  %v726_v26 = vmul.f32 %v2595_v25, %v3019_v34  ;;  %v2597_v37 = vpop.eup %2596  ;;  %v2447_v34 = vld [vmem:[#allocation7 + $0x20] sm:$0xff]  }
 0x490   :  { %v728_v31 = vmul.f32 %v2597_v37, %v3021_v35  ;;  %v2448_v35 = vld [vmem:[#allocation7 + $0x18] sm:$0xff]  }
 0x491   :  { %v737_v28 = vpack.c.bf16 %v726_v26, %v724_v29  ;;  %2375 = vmatpush3.bf16.msra.mxu1 %v2446_v33 }
 0x492   :  { %v2599_v38 = vpop.eup %2598  ;;  %2376 = vmatprep.subr.bf16.mxu1 %v2746_v4 }
 0x493   :  { %2366 = vmatprep.mubr.bf16.mxu1 %v737_v28  ;;  %v730_v39 = vmul.f32 %v2599_v38, %v3025_v36  ;;  %v2449_v36 = vld [vmem:[#allocation7 + $0x10] sm:$0xff]  }
 0x495   :  { %v738_v40 = vpack.c.bf16 %v730_v39, %v728_v31  ;;  %2377 = vmatpush3.bf16.msra.mxu1 %v2447_v34  ;;  %v2113_v34 = vld [vmem:[%s3447_s7 + $0x3] ss:$0 sm:$0xff] }
 0x496   :  { %2378 = vmatprep.subr.bf16.mxu1 %v2746_v4 }
 0x497   :  { %2367 = vmatmul.mubr.bf16.gmra.mxu1 %v738_v40 }
 0x498   :  { %2386 = vmatprep.mubr.msk.bf16.mxu1 %vm2748_vm0, %v2746_v4 }
 0x499   :  { %2379 = vmatpush3.bf16.msra.mxu1 %v2448_v35 }
 0x49a   :  { %2380 = vmatprep.subr.bf16.mxu1 %v2746_v4 }
 0x49d   :  { %2381 = vmatpush3.bf16.msra.mxu1 %v2449_v36 }
 0x49e   :  { %2382 = vmatprep.subr.bf16.mxu1 %v2746_v4 }
 0x4a1   :  { %2383 = vmatpush3.bf16.msra.mxu1 %v2450_v41 }
 0x4a2   :  { %2384 = vmatprep.subr.bf16.mxu1 %v2746_v4 }
 0x4a5   :  { %2385 = vmatpush3.bf16.msra.mxu1 %v2451_v42 }
 0x53f   :  { %v2356_v43 = vpop.f32.mrf.mxu1 }
 0x541   :  { %v773_v45 = vpop.f32.mrf.mxu1 }
 0x542   :  { %v836_v51 = vadd.f32 %v2356_v43, %v773_v45  ;;  %v2628_v43 = vld [vmem:[%s3440_s0] sm:$0xff] }
 0x543   :  { %v2357_v46 = vpop.f32.mrf.mxu1 }
 0x545   :  { %v776_v44 = vpop.f32.mrf.mxu1 }
 0x546   :  { %v837_v53 = vadd.f32 %v2357_v46, %v776_v44 }
 0x547   :  { %v2360_v47 = vpop.f32.mrf.mxu1 }
 0x549   :  { %v789_v48 = vpop.f32.mrf.mxu1 }
 0x54a   :  { %v838_v57 = vadd.f32 %v836_v51, %v789_v48  ;;  %v2455_v51 = vld [vmem:[%s3445_s5 + $0xe8] ss:$16 sps:$4 sm:$0xff]  }
 0x54b   :  { %v2361_v50 = vpop.f32.mrf.mxu1 }
 0x54c   :  { %v840_v63 = vadd.f32 %v2360_v47, %v838_v57  ;;  %v2629_v47 = vld [vmem:[%s3440_s0 + $0x8] sm:$0xff] }
 0x54d   :  { %v792_v49 = vpop.f32.mrf.mxu1 }
 0x54e   :  { %v839_v61 = vadd.f32 %v837_v53, %v792_v49  ;;  %v2454_v49 = vld [vmem:[%s3445_s5 + $0xe4] ss:$16 sps:$4 sm:$0xff]  }
 0x54f   :  { %v2364_v52 = vpop.f32.mrf.mxu1  ;;  %1250 = vmatprep.subr.bf16.mxu0 %v2454_v49 }
 0x550   :  { %v841_v1 = vadd.f32 %v2361_v50, %v839_v61  ;;  %v2452_v50 = vld [vmem:[%s3445_s5 + $0xe0] ss:$16 sps:$4 sm:$0xff]  }
 0x551   :  { %v805_v59 = vpop.f32.mrf.mxu1  ;;  %1251 = vmatpush1.bf16.msra.mxu0 %v2452_v50  ;;  %v3193_v50 = vsub.s32 3, %v2847_v54 }
 0x552   :  { %v842_v4 = vadd.f32 %v840_v63, %v805_v59 }
 0x553   :  { %v2365_v62 = vpop.f32.mrf.mxu1 }
 0x554   :  { %v844_v6 = vadd.f32 %v2364_v52, %v842_v4  ;;  %v2457_v52 = vld [vmem:[%s3445_s5 + $0xec] ss:$16 sps:$4 sm:$0xff]  }
 0x555   :  { %v808_v0 = vpop.f32.mrf.mxu1  ;;  %1293 = vmatprep.subr.bf16.mxu1 %v2457_v52 }
 0x556   :  { %v843_v2 = vadd.f32 %v841_v1, %v808_v0  ;;  %v2460_v1 = vld [vmem:[%s3445_s5 + $0xc4] ss:$16 sps:$4 sm:$0xff]  }
 0x557   :  { %v2368_v60 = vpop.f32.mrf.mxu1  ;;  %1252 = vmatprep.subr.bf16.mxu0 %v2460_v1 }
 0x558   :  { %v845_v9 = vadd.f32 %v2365_v62, %v843_v2  ;;  %v2458_v2 = vld [vmem:[%s3445_s5 + $0xc0] ss:$16 sps:$4 sm:$0xff]  }
 0x559   :  { %v821_v3 = vpop.f32.mrf.mxu1  ;;  %1253 = vmatpush1.bf16.msra.mxu0 %v2458_v2 }
 0x55a   :  { %v846_v8 = vadd.f32 %v844_v6, %v821_v3  ;;  %v2461_v3 = vld [vmem:[%s3445_s5 + $0xc8] ss:$16 sps:$4 sm:$0xff]   ;;  %v2466_v6 = vld [vmem:[%s3445_s5 + $0xa4] ss:$16 sps:$4 sm:$0xff]  }
 0x55b   :  { %v2369_v7 = vpop.f32.mrf.mxu1  ;;  %1254 = vmatprep.subr.bf16.mxu0 %v2466_v6 }
 0x55c   :  { %v848_v11 = vadd.f32 %v2368_v60, %v846_v8  ;;  %v2463_v60 = vld [vmem:[%s3445_s5 + $0xcc] ss:$16 sps:$4 sm:$0xff]   ;;  %v2464_v8 = vld [vmem:[%s3445_s5 + $0xa0] ss:$16 sps:$4 sm:$0xff]  }
 0x55d   :  { %v824_v5 = vpop.f32.mrf.mxu1  ;;  %1255 = vmatpush1.bf16.msra.mxu0 %v2464_v8 }
 0x55e   :  { %v847_v10 = vadd.f32 %v845_v9, %v824_v5  ;;  %v2467_v9 = vld [vmem:[%s3445_s5 + $0xa8] ss:$16 sps:$4 sm:$0xff]   ;;  %v2472_v5 = vld [vmem:[%s3445_s5 + $0x84] ss:$16 sps:$4 sm:$0xff]  }
 0x55f   :  { %1256 = vmatprep.subr.bf16.mxu0 %v2472_v5 }
 0x560   :  { %v849_v12 = vadd.f32 %v2369_v7, %v847_v10  ;;  %v2469_v7 = vld [vmem:[%s3445_s5 + $0xac] ss:$16 sps:$4 sm:$0xff]  }
 0x561   :  { %v2475_v10 = vld [vmem:[%s3445_s5 + $0x8c] ss:$16 sps:$4 sm:$0xff]  }
 0x562   :  { %v850_v14 = vpack.c.bf16 %v849_v12, %v848_v11  ;;  %v2470_v11 = vld [vmem:[%s3445_s5 + $0x80] ss:$16 sps:$4 sm:$0xff]   ;;  %v2473_v12 = vld [vmem:[%s3445_s5 + $0x88] ss:$16 sps:$4 sm:$0xff]  }
 0x563   :  { %1257 = vmatpush1.bf16.msra.mxu0 %v2470_v11 }
 0x564   :  { %2387 = vmatmul.mubr.bf16.vlgmr.msra.gmra.mxu1 %v850_v14  ;;  %v2478_v14 = vld [vmem:[%s3445_s5 + $0x64] ss:$16 sps:$4 sm:$0xff]  }
 0x565   :  { %1325 = vmatprep.mubr.bf16.mxu1 %v2747_v27  ;;  %1294 = vmatpush1.bf16.msra.mxu1 %v2455_v51 }
 0x566   :  { %1295 = vmatprep.subr.bf16.mxu1 %v2463_v60  ;;  %1258 = vmatprep.subr.bf16.mxu0 %v2478_v14 }
 0x569   :  { %1296 = vmatpush1.bf16.msra.mxu1 %v2461_v3 }
 0x56a   :  { %1297 = vmatprep.subr.bf16.mxu1 %v2469_v7 }
 0x56d   :  { %1298 = vmatpush1.bf16.msra.mxu1 %v2467_v9 }
 0x56e   :  { %1299 = vmatprep.subr.bf16.mxu1 %v2475_v10 }
 0x571   :  { %1300 = vmatpush1.bf16.msra.mxu1 %v2473_v12 }
 0x624   :  { %v954_v16 = vpop.f32.mrf.mxu1 }
 0x625   :  { %v955_v13 = vadd.f32 %v2103_v15, %v954_v16  ;;  %v2476_v16 = vld [vmem:[%s3445_s5 + $0x60] ss:$16 sps:$4 sm:$0xff]  }
 0x626   :  { %v2388_v17 = vpop.f32.mrf.mxu1  ;;  %1259 = vmatpush1.bf16.msra.mxu0 %v2476_v16 }
 0x627   :  { %963 = vadd.xlane.f32.xlu0 %v955_v13  ;;  %v2484_v17 = vld [vmem:[%s3445_s5 + $0x44] ss:$16 sps:$4 sm:$0xff]  }
 0x628   :  { %v957_v18 = vpop.f32.mrf.mxu1  ;;  %1260 = vmatprep.subr.bf16.mxu0 %v2484_v17 }
 0x629   :  { %v958_v19 = vadd.f32 %v2103_v15, %v957_v18  ;;  %v2481_v15 = vld [vmem:[%s3445_s5 + $0x6c] ss:$16 sps:$4 sm:$0xff]  }
 0x62a   :  { %v2389_v20 = vpop.f32.mrf.mxu1  ;;  %1301 = vmatprep.subr.bf16.mxu1 %v2481_v15  ;;  %v2487_v18 = vld [vmem:[%s3445_s5 + $0x4c] ss:$16 sps:$4 sm:$0xff]  }
 0x62b   :  { %965 = vadd.xlane.f32.xlu1 %v958_v19  ;;  %v2485_v20 = vld [vmem:[%s3445_s5 + $0x48] ss:$16 sps:$4 sm:$0xff]  }
 0x6b0   :  { %v964_v22 = vpop.xlane.xlu0 %963 }
 0x6b1   :  { %v967_v21 = vmul.f32 0.0078125, %v964_v22  ;;  %v2488_v22 = vld [vmem:[%s3445_s5 + $0x20] ss:$16 sps:$4 sm:$0xff]  }
 0x6b3   :  { %v969_v23 = vsub.f32 %v955_v13, %v967_v21  ;;  %v2479_v13 = vld [vmem:[%s3445_s5 + $0x68] ss:$16 sps:$4 sm:$0xff]   ;;  %v2490_v21 = vld [vmem:[%s3445_s5 + $0x24] ss:$16 sps:$4 sm:$0xff]  }
 0x6b4   :  { %v966_v24 = vpop.xlane.xlu1 %965  ;;  %1302 = vmatpush1.bf16.msra.mxu1 %v2479_v13 }
 0x6b5   :  { %v968_v25 = vmul.f32 0.0078125, %v966_v24  ;;  %v971_v29 = vmul.f32 %v969_v23, %v969_v23  ;;  %1303 = vmatprep.subr.bf16.mxu1 %v2487_v18  ;;  %v2493_v24 = vld [vmem:[%s3445_s5 + $0x2c] ss:$16 sps:$4 sm:$0xff]  }
 0x6b7   :  { %v970_v26 = vsub.f32 %v958_v19, %v968_v25  ;;  %973 = vadd.xlane.f32.xlu0 %v971_v29  ;;  %v2482_v19 = vld [vmem:[%s3445_s5 + $0x40] ss:$16 sps:$4 sm:$0xff]   ;;  %v2496_v25 = vld [vmem:[%s3445_s5 + $0x4] ss:$16 sps:$4 sm:$0xff]   ;;  %v2499_v29 = vld [vmem:[%s3445_s5 + $0xc] ss:$16 sps:$4 sm:$0xff]  }
 0x6b8   :  { %1261 = vmatpush1.bf16.msra.mxu0 %v2482_v19  ;;  %1304 = vmatpush1.bf16.msra.mxu1 %v2485_v20 }
 0x6b9   :  { %v972_v27 = vmul.f32 %v970_v26, %v970_v26  ;;  %1262 = vmatprep.subr.bf16.mxu0 %v2490_v21  ;;  %1305 = vmatprep.subr.bf16.mxu1 %v2493_v24 }
 0x6bb   :  { %975 = vadd.xlane.f32.xlu1 %v972_v27  ;;  %v2497_v27 = vld [vmem:[%s3445_s5 + $0x8] ss:$16 sps:$4 sm:$0xff]  }
 0x6bc   :  { %1263 = vmatpush1.bf16.msra.mxu0 %v2488_v22 }
 0x6bd   :  { %1264 = vmatprep.subr.bf16.mxu0 %v2496_v25 }
 0x740   :  { %v974_v37 = vpop.xlane.xlu0 %973 }
 0x741   :  { %v977_v28 = vmul.f32 0.0078125, %v974_v37 }
 0x743   :  { %v979_v38 = vadd.f32 1e-05, %v977_v28 }
 0x744   :  { %v976_v31 = vpop.xlane.xlu1 %975 }
 0x745   :  { %2600 = vrsqrt.f32 %v979_v38  ;;  %v978_v39 = vmul.f32 0.0078125, %v976_v31 }
 0x747   :  { %v980_v40 = vadd.f32 1e-05, %v978_v39 }
 0x749   :  { %2602 = vrsqrt.f32 %v980_v40 }
 0x752   :  { %v2601_v32 = vpop.eup %2600 }
 0x753   :  { %v983_v33 = vmul.f32 %v2601_v32, %v969_v23  ;;  %v2491_v23 = vld [vmem:[%s3445_s5 + $0x28] ss:$16 sps:$4 sm:$0xff]  }
 0x754   :  { %1306 = vmatpush1.bf16.msra.mxu1 %v2491_v23 }
 0x755   :  { %v989_v35 = vmul.f32 %v2112_v30, %v983_v33  ;;  %1307 = vmatprep.subr.bf16.mxu1 %v2499_v29  ;;  %v2114_v33 = vld [vmem:[%s3447_s7 + $0x4] ss:$0 sm:$0xff] }
 0x756   :  { %v2603_v36 = vpop.eup %2602 }
 0x757   :  { %v995_v41 = vadd.f32 %v2113_v34, %v989_v35  ;;  %v984_v42 = vmul.f32 %v2603_v36, %v970_v26  ;;  %v2494_v26 = vld [vmem:[%s3445_s5] ss:$16 sps:$4 sm:$0xff]  }
 0x758   :  { %1265 = vmatpush1.bf16.msra.mxu0 %v2494_v26  ;;  %1308 = vmatpush1.bf16.msra.mxu1 %v2497_v27 }
 0x759   :  { %v3066_v45 = vadd.f32 %v2628_v43, %v995_v41  ;;  %v990_v46 = vmul.f32 %v2112_v30, %v984_v42  ;;  %v2115_v41 = vld [vmem:[%s3447_s7 + $0x5] ss:$0 sm:$0xff] }
 0x75b   :  { %1001 = vadd.xlane.f32.xlu0 %v3066_v45  ;;  %v996_v44 = vadd.f32 %v2113_v34, %v990_v46 }
 0x75d   :  { %v3072_v48 = vadd.f32 %v2629_v47, %v996_v44  ;;  %v1068_v47 = vld [vmem:[%s3448_s8] ss:$4 sm:$0xf] }
 0x75e   :  { %v1073_v49 = vrot.slane %v1068_v47, %v2850_v55  ;;  %v1081_v51 = vrot.slane %v1068_v47, %v2853_v56 }
 0x75f   :  { %1003 = vadd.xlane.f32.xlu1 %v3072_v48 }
 0x7e4   :  { %v1002_v53 = vpop.xlane.xlu0 %1001 }
 0x7e5   :  { %v1005_v57 = vmul.f32 0.0078125, %v1002_v53 }
 0x7e7   :  { %v3088_v59 = vsub.f32 %v3066_v45, %v1005_v57  ;;  %v3198_v57 = vrot.slane %v1068_v47, %v2859_v58 }
 0x7e8   :  { %v1004_v61 = vpop.xlane.xlu1 %1003 }
 0x7e9   :  { %v1006_v62 = vmul.f32 0.0078125, %v1004_v61  ;;  %v1009_v63 = vmul.f32 %v3088_v59, %v3088_v59 }
 0x7eb   :  { %v3093_v0 = vsub.f32 %v3072_v48, %v1006_v62  ;;  %1011 = vadd.xlane.f32.xlu0 %v1009_v63 }
 0x7ed   :  { %v1010_v4 = vmul.f32 %v3093_v0, %v3093_v0 }
 0x7ef   :  { %1013 = vadd.xlane.f32.xlu1 %v1010_v4 }
 0x874   :  { %v1012_v37 = vpop.xlane.xlu0 %1011 }
 0x875   :  { %v1015_v28 = vmul.f32 0.0078125, %v1012_v37 }
 0x877   :  { %v1017_v38 = vadd.f32 1e-05, %v1015_v28 }
 0x878   :  { %v1014_v31 = vpop.xlane.xlu1 %1013 }
 0x879   :  { %2604 = vrsqrt.f32 %v1017_v38  ;;  %v1016_v39 = vmul.f32 0.0078125, %v1014_v31 }
 0x87b   :  { %v1018_v40 = vadd.f32 1e-05, %v1016_v39 }
 0x87d   :  { %2606 = vrsqrt.f32 %v1018_v40 }
 0x886   :  { %v2605_v32 = vpop.eup %2604 }
 0x887   :  { %v1021_v30 = vmul.f32 %v2605_v32, %v3088_v59  ;;  %v3201_v59 = vrot.slane %v1068_v47, %v3193_v50 }
 0x889   :  { %v1027_v36 = vmul.f32 %v2114_v33, %v1021_v30 }
 0x88a   :  { %v2607_v34 = vpop.eup %2606 }
 0x88b   :  { %v1022_v35 = vmul.f32 %v2607_v34, %v3093_v0  ;;  %v1033_v43 = vadd.f32 %v2115_v41, %v1027_v36 }
 0x88d   :  { %v1028_v42 = vmul.f32 %v2114_v33, %v1022_v35 }
 0x88f   :  { %v1034_v46 = vadd.f32 %v2115_v41, %v1028_v42 }
 0x891   :  { %v1035_v44 = vpack.c.bf16 %v1034_v46, %v1033_v43 }
 0x893   :  { %1283 = vmatmul.mubr.bf16.vlgmr.msra.gmra.mxu0 %v1035_v44  ;;  %1326 = vmatmul.mubr.bf16.vlgmr.msra.gmra.mxu1 %v1035_v44 }
 0x953   :  { %v1284_v52 = vpop.f32.mrf.mxu0  ;;  %v1327_v53 = vpop.f32.mrf.mxu1 }
 0x954   :  { %v3203_v61 = vadd.f32 %v1284_v52, %v1073_v49  ;;  %v3205_v62 = vadd.f32 %v1327_v53, %v1081_v51 }
 0x955   :  { %v1286_v63 = vpop.f32.mrf.mxu0  ;;  %v1329_v0 = vpop.f32.mrf.mxu1 }
 0x956   :  { %v1344_v54 = vmul.f32 0.70710677, %v3203_v61  ;;  %v1346_v4 = vmul.f32 0.70710677, %v3205_v62  ;;  %v3210_v1 = vadd.f32 %v1286_v63, %v3198_v57  ;;  %v3213_v60 = vadd.f32 %v1329_v0, %v3201_v59 }
 0x957   :  { %v1288_v2 = vpop.f32.mrf.mxu0  ;;  %v1331_v44 = vpop.f32.mrf.mxu1 }
 0x958   :  { %v3215_v3 = vclamps-f32 %v1344_v54, 3.832507  ;;  %v3217_v6 = vclamps-f32 %v1346_v4, 3.832507  ;;  %v3219_v7 = vadd.f32 %v1288_v2, %v1073_v49  ;;  %v1345_v8 = vmul.f32 0.70710677, %v3210_v1 }
 0x959   :  { %v1347_v9 = vmul.f32 0.70710677, %v3213_v60  ;;  %v3268_v0 = vadd.f32 %v1331_v44, %v1081_v51 }
 0x95a   :  { %v3225_v5 = vmul.f32 %v3215_v3, %v3215_v3  ;;  %v3229_v10 = vmul.f32 %v3217_v6, %v3217_v6  ;;  %v1348_v11 = vmul.f32 0.70710677, %v3219_v7  ;;  %v3232_v12 = vclamps-f32 %v1345_v8, 3.832507  ;;  %v1290_v8 = vpop.f32.mrf.mxu0 }
 0x95b   :  { %v3234_v14 = vclamps-f32 %v1347_v9, 3.832507  ;;  %v3277_v51 = vadd.f32 %v1290_v8, %v3198_v57 }
 0x95c   :  { %v1376_v15 = vmul.f32 -2.7261424e-10, %v3225_v5  ;;  %v1480_v16 = vmul.f32 -1.45660715e-05, %v3225_v5  ;;  %v1378_v13 = vmul.f32 -2.7261424e-10, %v3229_v10  ;;  %v3242_v18 = vmul.f32 %v3232_v12, %v3232_v12 }
 0x95d   :  { %v1482_v17 = vmul.f32 -1.45660715e-05, %v3229_v10  ;;  %v3244_v19 = vclamps-f32 %v1348_v11, 3.832507  ;;  %v3255_v27 = vmul.f32 %v3234_v14, %v3234_v14 }
 0x95e   :  { %v1384_v20 = vadd.f32 2.7706815e-08, %v1376_v15  ;;  %v1488_v22 = vadd.f32 -0.00021337405, %v1480_v16  ;;  %v1386_v21 = vadd.f32 2.7706815e-08, %v1378_v13 }
 0x95f   :  { %v1377_v23 = vmul.f32 -2.7261424e-10, %v3242_v18  ;;  %v1481_v24 = vmul.f32 -1.45660715e-05, %v3242_v18  ;;  %v3250_v25 = vmul.f32 %v3244_v19, %v3244_v19  ;;  %v1490_v26 = vadd.f32 -0.00021337405, %v1482_v17 }
 0x960   :  { %v1392_v29 = vmul.f32 %v1384_v20, %v3225_v5  ;;  %v1496_v37 = vmul.f32 %v1488_v22, %v3225_v5  ;;  %v1394_v38 = vmul.f32 %v1386_v21, %v3229_v10  ;;  %v1379_v30 = vmul.f32 -2.7261424e-10, %v3255_v27 }
 0x961   :  { %v1385_v28 = vadd.f32 2.7706815e-08, %v1377_v23  ;;  %v1489_v31 = vadd.f32 -0.00021337405, %v1481_v24  ;;  %v1380_v39 = vmul.f32 -2.7261424e-10, %v3250_v25  ;;  %v1498_v32 = vmul.f32 %v1490_v26, %v3229_v10 }
 0x962   :  { %v1400_v40 = vadd.f32 -2.101024e-06, %v1392_v29  ;;  %v1504_v33 = vadd.f32 -0.001682827, %v1496_v37  ;;  %v1402_v35 = vadd.f32 -2.101024e-06, %v1394_v38 }
 0x963   :  { %v1393_v34 = vmul.f32 %v1385_v28, %v3242_v18  ;;  %v1497_v36 = vmul.f32 %v1489_v31, %v3242_v18  ;;  %v1388_v41 = vadd.f32 2.7706815e-08, %v1380_v39  ;;  %v1506_v43 = vadd.f32 -0.001682827, %v1498_v32 }
 0x964   :  { %v1408_v42 = vmul.f32 %v1400_v40, %v3225_v5  ;;  %v1387_v46 = vadd.f32 2.7706815e-08, %v1379_v30  ;;  %v1512_v47 = vmul.f32 %v1504_v33, %v3225_v5  ;;  %v1410_v52 = vmul.f32 %v1402_v35, %v3229_v10  ;;  %v1333_v35 = vpop.f32.mrf.mxu1 }
 0x965   :  { %v1401_v49 = vadd.f32 -2.101024e-06, %v1393_v34  ;;  %v1505_v53 = vadd.f32 -0.001682827, %v1497_v36  ;;  %v1396_v63 = vmul.f32 %v1388_v41, %v3250_v25  ;;  %v1514_v4 = vmul.f32 %v1506_v43, %v3229_v10 }
 0x966   :  { %v1416_v54 = vadd.f32 -5.6925062e-05, %v1408_v42  ;;  %v1395_v2 = vmul.f32 %v1387_v46, %v3255_v27  ;;  %v1520_v9 = vadd.f32 -0.0073733293, %v1512_v47  ;;  %v1418_v15 = vadd.f32 -5.6925062e-05, %v1410_v52 }
 0x967   :  { %v1409_v11 = vmul.f32 %v1401_v49, %v3242_v18  ;;  %v1513_v16 = vmul.f32 %v1505_v53, %v3242_v18  ;;  %v1484_v13 = vmul.f32 -1.45660715e-05, %v3250_v25  ;;  %v1404_v17 = vadd.f32 -2.101024e-06, %v1396_v63 }
 0x968   :  { %v1350_v20 = vmul.f32 0.70710677, %v3268_v0  ;;  %v1424_v22 = vmul.f32 %v1416_v54, %v3225_v5  ;;  %v1522_v21 = vadd.f32 -0.0073733293, %v1514_v4  ;;  %v1403_v23 = vadd.f32 -2.101024e-06, %v1395_v2 }
 0x969   :  { %v1492_v24 = vadd.f32 -0.00021337405, %v1484_v13  ;;  %v1528_v29 = vmul.f32 %v1520_v9, %v3225_v5  ;;  %v1417_v26 = vadd.f32 -5.6925062e-05, %v1409_v11  ;;  %v1426_v28 = vmul.f32 %v1418_v15, %v3229_v10 }
 0x96a   :  { %v3281_v37 = vclamps-f32 %v1350_v20, 3.832507  ;;  %v1521_v38 = vadd.f32 -0.0073733293, %v1513_v16  ;;  %v1412_v39 = vmul.f32 %v1404_v17, %v3250_v25  ;;  %v1349_v40 = vmul.f32 0.70710677, %v3277_v51 }
 0x96b   :  { %v1500_v31 = vmul.f32 %v1492_v24, %v3250_v25  ;;  %v1432_v32 = vadd.f32 -0.00073499064, %v1424_v22  ;;  %v1530_v30 = vmul.f32 %v1522_v21, %v3229_v10  ;;  %v1411_v33 = vmul.f32 %v1403_v23, %v3255_v27 }
 0x96c   :  { %v3288_v57 = vmul.f32 %v3281_v37, %v3281_v37  ;;  %v1536_v36 = vadd.f32 -0.014264739, %v1528_v29  ;;  %v1425_v41 = vmul.f32 %v1417_v26, %v3242_v18  ;;  %v1434_v46 = vadd.f32 -0.00073499064, %v1426_v28 }
 0x96d   :  { %v1508_v34 = vadd.f32 -0.001682827, %v1500_v31  ;;  %v1529_v44 = vmul.f32 %v1521_v38, %v3242_v18  ;;  %v3298_v49 = vclamps-f32 %v1349_v40, 3.832507  ;;  %v1420_v52 = vadd.f32 -5.6925062e-05, %v1412_v39 }
 0x96e   :  { %v1382_v42 = vmul.f32 -2.7261424e-10, %v3288_v57  ;;  %v1486_v43 = vmul.f32 -1.45660715e-05, %v3288_v57  ;;  %v3301_v54 = vadd.f32 %v1333_v35, %v3201_v59  ;;  %v1440_v4 = vmul.f32 %v1432_v32, %v3225_v5 }
 0x96f   :  { %v1516_v47 = vmul.f32 %v1508_v34, %v3250_v25  ;;  %v1538_v2 = vadd.f32 -0.014264739, %v1530_v30  ;;  %v1419_v8 = vadd.f32 -5.6925062e-05, %v1411_v33  ;;  %v3306_v9 = vmul.f32 %v3298_v49, %v3298_v49 }
 0x970   :  { %v1390_v53 = vadd.f32 2.7706815e-08, %v1382_v42  ;;  %v1494_v63 = vadd.f32 -0.00021337405, %v1486_v43  ;;  %2608 = vrcp.f32 %v1536_v36  ;;  %v1433_v11 = vadd.f32 -0.00073499064, %v1425_v41 }
 0x971   :  { %v1442_v13 = vmul.f32 %v1434_v46, %v3229_v10  ;;  %v1537_v17 = vadd.f32 -0.014264739, %v1529_v44  ;;  %v1524_v20 = vadd.f32 -0.0073733293, %v1516_v47  ;;  %v1381_v59 = vmul.f32 -2.7261424e-10, %v3306_v9 }
 0x972   :  { %v1398_v15 = vmul.f32 %v1390_v53, %v3288_v57  ;;  %v1502_v16 = vmul.f32 %v1494_v63, %v3288_v57  ;;  %v1428_v22 = vmul.f32 %v1420_v52, %v3250_v25  ;;  %v1485_v24 = vmul.f32 -1.45660715e-05, %v3306_v9 }
 0x973   :  { %2610 = vrcp.f32 %v1538_v2  ;;  %v1389_v29 = vadd.f32 2.7706815e-08, %v1381_v59  ;;  %v1351_v26 = vmul.f32 0.70710677, %v3301_v54  ;;  %v1483_v28 = vmul.f32 -1.45660715e-05, %v3255_v27 }
 0x974   :  { %v1406_v21 = vadd.f32 -2.101024e-06, %v1398_v15  ;;  %v1510_v23 = vadd.f32 -0.001682827, %v1502_v16  ;;  %v1441_v38 = vmul.f32 %v1433_v11, %v3242_v18  ;;  %v1427_v31 = vmul.f32 %v1419_v8, %v3255_v27 }
 0x975   :  { %v1448_v32 = vadd.f32 -0.0029546, %v1440_v4  ;;  %2612 = vrcp.f32 %v1537_v17  ;;  %v1397_v30 = vmul.f32 %v1389_v29, %v3306_v9  ;;  %v1493_v33 = vadd.f32 -0.00021337405, %v1485_v24 }
 0x976   :  { %v1414_v39 = vmul.f32 %v1406_v21, %v3288_v57  ;;  %v1518_v40 = vmul.f32 %v1510_v23, %v3288_v57  ;;  %v1436_v34 = vadd.f32 -0.00073499064, %v1428_v22  ;;  %v1532_v35 = vmul.f32 %v1524_v20, %v3250_v25 }
 0x977   :  { %v1405_v42 = vadd.f32 -2.101024e-06, %v1397_v30  ;;  %v1501_v43 = vmul.f32 %v1493_v33, %v3306_v9  ;;  %v3323_v46 = vclamps-f32 %v1351_v26, 3.832507  ;;  %v1491_v44 = vadd.f32 -0.00021337405, %v1483_v28 }
 0x978   :  { %v1422_v36 = vadd.f32 -5.6925062e-05, %v1414_v39  ;;  %v1526_v41 = vadd.f32 -0.0073733293, %v1518_v40  ;;  %v1450_v47 = vadd.f32 -0.0029546, %v1442_v13  ;;  %v1456_v15 = vmul.f32 %v1448_v32, %v3225_v5 }
 0x979   :  { %v1449_v52 = vadd.f32 -0.0029546, %v1441_v38  ;;  %v1435_v53 = vadd.f32 -0.00073499064, %v1427_v31  ;;  %v1413_v4 = vmul.f32 %v1405_v42, %v3306_v9  ;;  %v1509_v2 = vadd.f32 -0.001682827, %v1501_v43 }
 0x97a   :  { %v1430_v63 = vmul.f32 %v1422_v36, %v3288_v57  ;;  %v3329_v8 = vmul.f32 %v3323_v46, %v3323_v46  ;;  %v1499_v11 = vmul.f32 %v1491_v44, %v3255_v27  ;;  %v1444_v16 = vmul.f32 %v1436_v34, %v3250_v25 }
 0x97b   :  { %v1540_v17 = vadd.f32 -0.014264739, %v1532_v35  ;;  %v1534_v13 = vmul.f32 %v1526_v41, %v3288_v57  ;;  %v1421_v20 = vadd.f32 -5.6925062e-05, %v1413_v4  ;;  %v1517_v59 = vmul.f32 %v1509_v2, %v3306_v9 }
 0x97c   :  { %v1383_v22 = vmul.f32 -2.7261424e-10, %v3329_v8  ;;  %v1507_v21 = vadd.f32 -0.001682827, %v1499_v11  ;;  %v1458_v23 = vmul.f32 %v1450_v47, %v3229_v10  ;;  %v1457_v24 = vmul.f32 %v1449_v52, %v3242_v18 }
 0x97d   :  { %v1438_v29 = vadd.f32 -0.00073499064, %v1430_v63  ;;  %v1487_v26 = vmul.f32 -1.45660715e-05, %v3329_v8  ;;  %v2609_v28 = vpop.eup %2608  ;;  %v1429_v5 = vmul.f32 %v1421_v20, %v3306_v9  ;;  %v1525_v38 = vadd.f32 -0.0073733293, %v1517_v59 }
 0x97e   :  { %v1391_v31 = vadd.f32 2.7706815e-08, %v1383_v22  ;;  %v1515_v39 = vmul.f32 %v1507_v21, %v3255_v27  ;;  %v1452_v40 = vadd.f32 -0.0029546, %v1444_v16  ;;  %2614 = vrcp.f32 %v1540_v17 }
 0x97f   :  { %v1542_v32 = vadd.f32 -0.014264739, %v1534_v13  ;;  %v1495_v30 = vadd.f32 -0.00021337405, %v1487_v26  ;;  %v1437_v33 = vadd.f32 -0.00073499064, %v1429_v5  ;;  %v1533_v34 = vmul.f32 %v1525_v38, %v3306_v9 }
 0x980   :  { %v1399_v10 = vmul.f32 %v1391_v31, %v3329_v8  ;;  %v1523_v18 = vadd.f32 -0.0073733293, %v1515_v39  ;;  %v2611_v35 = vpop.eup %2610  ;;  %v1465_v36 = vadd.f32 -0.016096033, %v1457_v24  ;;  %v1443_v41 = vmul.f32 %v1435_v53, %v3255_v27 }
 0x981   :  { %v1446_v42 = vmul.f32 %v1438_v29, %v3288_v57  ;;  %v1503_v43 = vmul.f32 %v1495_v30, %v3329_v8  ;;  %v1445_v44 = vmul.f32 %v1437_v33, %v3306_v9  ;;  %v1541_v47 = vadd.f32 -0.014264739, %v1533_v34 }
 0x982   :  { %v1407_v52 = vadd.f32 -2.101024e-06, %v1399_v10  ;;  %v1531_v63 = vmul.f32 %v1523_v18, %v3255_v27  ;;  %v2613_v4 = vpop.eup %2612  ;;  %v1464_v2 = vadd.f32 -0.016096033, %v1456_v15  ;;  %2616 = vrcp.f32 %v1542_v32 }
 0x983   :  { %v1511_v11 = vadd.f32 -0.001682827, %v1503_v43  ;;  %v1460_v16 = vmul.f32 %v1452_v40, %v3250_v25  ;;  %v1453_v17 = vadd.f32 -0.0029546, %v1445_v44  ;;  %2618 = vrcp.f32 %v1541_v47 }
 0x984   :  { %v1415_v53 = vmul.f32 %v1407_v52, %v3329_v8  ;;  %v1473_v13 = vmul.f32 %v3232_v12, %v1465_v36  ;;  %v1454_v20 = vadd.f32 -0.0029546, %v1446_v42  ;;  %v1539_v59 = vadd.f32 -0.014264739, %v1531_v63 }
 0x985   :  { %v1519_v22 = vmul.f32 %v1511_v11, %v3329_v8  ;;  %v1466_v21 = vadd.f32 -0.016096033, %v1458_v23  ;;  %v1451_v24 = vadd.f32 -0.0029546, %v1443_v41  ;;  %v1472_v26 = vmul.f32 %v3215_v3, %v1464_v2 }
 0x986   :  { %v1423_v29 = vadd.f32 -5.6925062e-05, %v1415_v53  ;;  %v1547_v15 = vmul.f32 %v2613_v4, %v1473_v13  ;;  %2620 = vrcp.f32 %v1539_v59  ;;  %v1468_v38 = vadd.f32 -0.016096033, %v1460_v16 }
 0x987   :  { %v1527_v5 = vadd.f32 -0.0073733293, %v1519_v22  ;;  %v1461_v25 = vmul.f32 %v1453_v17, %v3306_v9  ;;  %v1545_v39 = vmul.f32 %v2609_v28, %v1472_v26  ;;  %v1462_v12 = vmul.f32 %v1454_v20, %v3288_v57 }
 0x988   :  { %v1431_v31 = vmul.f32 %v1423_v29, %v3329_v8  ;;  %v1474_v23 = vmul.f32 %v3217_v6, %v1466_v21  ;;  %v1561_v30 = vadd.f32 1.0, %v1547_v15  ;;  %v1459_v33 = vmul.f32 %v1451_v24, %v3255_v27 }
 0x989   :  { %v1535_v40 = vmul.f32 %v1527_v5, %v3329_v8  ;;  %v1337_v10 = vmul.f32 0.5, %v3210_v1  ;;  %v1476_v18 = vmul.f32 %v3244_v19, %v1468_v38  ;;  %v1469_v9 = vadd.f32 -0.016096033, %v1461_v25 }
 0x98a   :  { %v1439_v32 = vadd.f32 -0.00073499064, %v1431_v31  ;;  %v1560_v28 = vadd.f32 1.0, %v1545_v39  ;;  %v1549_v41 = vmul.f32 %v2611_v35, %v1474_v23  ;;  %v1470_v57 = vadd.f32 -0.016096033, %v1462_v12 }
 0x98b   :  { %v1543_v3 = vadd.f32 -0.014264739, %v1535_v40  ;;  %v2615_v34 = vpop.eup %2614  ;;  %v1336_v43 = vmul.f32 0.5, %v3203_v61  ;;  %v1569_v6 = vmul.f32 %v1561_v30, %v1337_v10  ;;  %v1467_v44 = vadd.f32 -0.016096033, %v1459_v33  ;;  %v2500_v30 = vld [vmem:[#allocation8 + $0x78] sm:$0xff]  }
 0x98c   :  { %v1447_v36 = vmul.f32 %v1439_v32, %v3329_v8  ;;  %v1553_v47 = vmul.f32 %v2615_v34, %v1476_v18  ;;  %v1477_v52 = vmul.f32 %v3298_v49, %v1469_v9  ;;  %v1562_v4 = vadd.f32 1.0, %v1549_v41  ;;  %v2501_v33 = vld [vmem:[#allocation8 + $0xf8] sm:$0xff]   ;;  %2242 = vmatprep.subr.bf16.mxu0 %v2500_v30 }
 0x98d   :  { %2622 = vrcp.f32 %v1543_v3  ;;  %v1568_v1 = vmul.f32 %v1560_v28, %v1336_v43  ;;  %v1478_v19 = vmul.f32 %v3281_v37, %v1470_v57  ;;  %v1338_v35 = vmul.f32 0.5, %v3205_v62  ;;  %2264 = vmatprep.subr.bf16.mxu1 %v2501_v33 }
 0x98e   :  { %v1455_v42 = vadd.f32 -0.0029546, %v1447_v36  ;;  %v1475_v16 = vmul.f32 %v3234_v14, %v1467_v44  ;;  %v1564_v17 = vadd.f32 1.0, %v1553_v47  ;;  %v1341_v20 = vmul.f32 0.5, %v3277_v51 }
 0x98f   :  { %v2617_v27 = vpop.eup %2616  ;;  %v1580_v53 = vadd.f32 %v1569_v6, %v1568_v1  ;;  %v1570_v49 = vmul.f32 %v1562_v4, %v1338_v35  ;;  %v1340_v22 = vmul.f32 0.5, %v3219_v7  ;;  %v1339_v37 = vmul.f32 0.5, %v3213_v60 }
 0x990   :  { %v2619_v63 = vpop.eup %2618  ;;  %v1463_v2 = vmul.f32 %v1455_v42, %v3329_v8  ;;  %v1557_v61 = vmul.f32 %v2617_v27, %v1478_v19  ;;  %v1342_v14 = vmul.f32 0.5, %v3268_v0  ;;  %v1343_v7 = vmul.f32 0.5, %v3301_v54 }
 0x991   :  { %v1555_v11 = vmul.f32 %v2619_v63, %v1477_v52  ;;  %v1572_v29 = vmul.f32 %v1564_v17, %v1340_v22  ;;  %v1581_v15 = vadd.f32 %v1580_v53, %v1570_v49  ;;  %v2503_v17 = vld [vmem:[#allocation8 + $0xb8] sm:$0xff]   ;;  %v2505_v53 = vld [vmem:[#allocation8 + $0xf0] sm:$0xff]   ;;  %v2510_v22 = vld [vmem:[#allocation8 + $0x28] sm:$0xff]  }
 0x992   :  { %v1471_v21 = vadd.f32 -0.016096033, %v1463_v2  ;;  %v1566_v62 = vadd.f32 1.0, %v1557_v61  ;;  %v2504_v61 = vld [vmem:[#allocation8 + $0x70] sm:$0xff]   ;;  %2265 = vmatpush3.bf16.msra.mxu1 %v2503_v17 }
 0x993   :  { %v2621_v13 = vpop.eup %2620  ;;  %v1565_v59 = vadd.f32 1.0, %v1555_v11  ;;  %2266 = vmatprep.subr.bf16.mxu1 %v2505_v53 }
 0x994   :  { %v1551_v24 = vmul.f32 %v2621_v13, %v1475_v16  ;;  %v1479_v5 = vmul.f32 %v3323_v46, %v1471_v21  ;;  %v1574_v31 = vmul.f32 %v1566_v62, %v1342_v14  ;;  %v2502_v16 = vld [vmem:[#allocation8 + $0x38] sm:$0xff]   ;;  %v2506_v13 = vld [vmem:[#allocation8 + $0x30] sm:$0xff]   ;;  %v2511_v21 = vld [vmem:[#allocation8 + $0xa8] sm:$0xff]  }
 0x995   :  { %v1573_v8 = vmul.f32 %v1565_v59, %v1341_v20  ;;  %2243 = vmatpush3.bf16.msra.mxu0 %v2502_v16  ;;  %v2507_v20 = vld [vmem:[#allocation8 + $0xb0] sm:$0xff]   ;;  %v2508_v59 = vld [vmem:[#allocation8 + $0x68] sm:$0xff]   ;;  %v2516_v62 = vld [vmem:[#allocation8 + $0x58] sm:$0xff]  }
 0x996   :  { %v1563_v26 = vadd.f32 1.0, %v1551_v24  ;;  %2244 = vmatprep.subr.bf16.mxu0 %v2504_v61  ;;  %2267 = vmatpush3.bf16.msra.mxu1 %v2507_v20  ;;  %v2512_v24 = vld [vmem:[#allocation8 + $0x60] sm:$0xff]   ;;  %v2519_v14 = vld [vmem:[#allocation8 + $0x98] sm:$0xff]  }
 0x997   :  { %v1585_v25 = vadd.f32 %v1573_v8, %v1572_v29 }
 0x998   :  { %v1571_v38 = vmul.f32 %v1563_v26, %v1339_v37  ;;  %v2513_v37 = vld [vmem:[#allocation8 + $0xe0] sm:$0xff]   ;;  %v2517_v26 = vld [vmem:[#allocation8 + $0xd8] sm:$0xff]  }
 0x999   :  { %v1586_v60 = vadd.f32 %v1585_v25, %v1574_v31  ;;  %2245 = vmatpush3.bf16.msra.mxu0 %v2506_v13  ;;  %v2522_v25 = vld [vmem:[#allocation8 + $0x10] sm:$0xff]  }
 0x99a   :  { %v2623_v51 = vpop.eup %2622  ;;  %v1582_v39 = vadd.f32 %v1581_v15, %v1571_v38  ;;  %2246 = vmatprep.subr.bf16.mxu0 %v2508_v59  ;;  %v2518_v15 = vld [vmem:[#allocation8 + $0x18] sm:$0xff]  }
 0x99b   :  { %v1559_v12 = vmul.f32 %v2623_v51, %v1479_v5  ;;  %v2520_v5 = vld [vmem:[#allocation8 + $0x50] sm:$0xff]  }
 0x99c   :  { %1583 = vadd.xlane.f32.xlu0 %v1582_v39  ;;  %v2523_v51 = vld [vmem:[#allocation8 + $0x90] sm:$0xff]   ;;  %v2525_v39 = vld [vmem:[#allocation8 + $0xc8] sm:$0xff]  }
 0x99d   :  { %v1567_v40 = vadd.f32 1.0, %v1559_v12  ;;  %2247 = vmatpush3.bf16.msra.mxu0 %v2510_v22  ;;  %v2526_v12 = vld [vmem:[#allocation8 + $0x8] sm:$0xff]  }
 0x99e   :  { %2248 = vmatprep.subr.bf16.mxu0 %v2512_v24 }
 0x99f   :  { %v1575_v32 = vmul.f32 %v1567_v40, %v1343_v7  ;;  %v2527_v7 = vld [vmem:[#allocation8 + $0x88] sm:$0xff]   ;;  %v2528_v40 = vld [vmem:[#allocation8 + $0x40] sm:$0xff]  }
 0x9a1   :  { %v1587_v23 = vadd.f32 %v1586_v60, %v1575_v32  ;;  %v2529_v60 = vld [vmem:[#allocation8 + $0xc0] sm:$0xff]  }
 0x9a3   :  { %1588 = vadd.xlane.f32.xlu1 %v1587_v23  ;;  %v2531_v23 = vld [vmem:[#allocation8 + $0x80] sm:$0xff]  }
 0xa25   :  { %v1584_v0 = vpop.xlane.xlu0 %1583 }
 0xa26   :  { %v1591_v46 = vmul.f32 0.001953125, %v1584_v0 }
 0xa28   :  { %v3375_v3 = vsub.f32 %v1568_v1, %v1591_v46  ;;  %v3377_v34 = vsub.f32 %v1569_v6, %v1591_v46  ;;  %v3379_v10 = vsub.f32 %v1570_v49, %v1591_v46  ;;  %v3381_v18 = vsub.f32 %v1571_v38, %v1591_v46  ;;  %v2509_v49 = vld [vmem:[#allocation8 + $0xe8] sm:$0xff]   ;;  %v2521_v38 = vld [vmem:[#allocation8 + $0xd0] sm:$0xff]  }
 0xa29   :  { %2268 = vmatprep.subr.bf16.mxu1 %v2509_v49 }
 0xa2a   :  { %v1601_v54 = vmul.f32 %v3375_v3, %v3375_v3  ;;  %v1602_v9 = vmul.f32 %v3377_v34, %v3377_v34  ;;  %v1603_v41 = vmul.f32 %v3379_v10, %v3379_v10  ;;  %v1604_v42 = vmul.f32 %v3381_v18, %v3381_v18  ;;  %2269 = vmatpush3.bf16.msra.mxu1 %v2511_v21 }
 0xa2b   :  { %2270 = vmatprep.subr.bf16.mxu1 %v2513_v37 }
 0xa2c   :  { %v1589_v36 = vpop.xlane.xlu1 %1588  ;;  %v1609_v57 = vadd.f32 %v1602_v9, %v1601_v54 }
 0xa2d   :  { %v1592_v28 = vmul.f32 0.001953125, %v1589_v36  ;;  %v2156_v36 = vld [vmem:[%s3448_s8 + $0x1] ss:$4 sm:$0xf] }
 0xa2e   :  { %v1610_v44 = vadd.f32 %v1609_v57, %v1603_v41  ;;  %v1641_v41 = vrot.slane %v2156_v36, %v2859_v58  ;;  %v1649_v57 = vrot.slane %v2156_v36, %v3193_v50 }
 0xa2f   :  { %v3391_v43 = vsub.f32 %v1572_v29, %v1592_v28  ;;  %v3393_v6 = vsub.f32 %v1573_v8, %v1592_v28  ;;  %v3395_v47 = vsub.f32 %v1574_v31, %v1592_v28  ;;  %v3397_v52 = vsub.f32 %v1575_v32, %v1592_v28  ;;  %v2514_v8 = vld [vmem:[#allocation8 + $0x20] sm:$0xff]   ;;  %v2524_v31 = vld [vmem:[#allocation8 + $0x48] sm:$0xff]  }
 0xa30   :  { %v1611_v27 = vadd.f32 %v1610_v44, %v1604_v42  ;;  %v2515_v29 = vld [vmem:[#allocation8 + $0xa0] sm:$0xff]   ;;  %2249 = vmatpush3.bf16.msra.mxu0 %v2514_v8  ;;  %v1637_v42 = vrot.slane %v2156_v36, %v2850_v55  ;;  %v1645_v44 = vrot.slane %v2156_v36, %v2853_v56 }
 0xa31   :  { %v1605_v63 = vmul.f32 %v3391_v43, %v3391_v43  ;;  %v1606_v1 = vmul.f32 %v3393_v6, %v3393_v6  ;;  %v1607_v4 = vmul.f32 %v3395_v47, %v3395_v47  ;;  %v1608_v2 = vmul.f32 %v3397_v52, %v3397_v52  ;;  %2271 = vmatpush3.bf16.msra.mxu1 %v2515_v29  ;;  %v2530_v32 = vld [vmem:[#allocation8] sm:$0xff]  }
 0xa32   :  { %1612 = vadd.xlane.f32.xlu0 %v1611_v27  ;;  %2250 = vmatprep.subr.bf16.mxu0 %v2516_v62  ;;  %v2157_v27 = vld [vmem:[%s3448_s8 + $0x2] ss:$4 sm:$0xf] }
 0xa33   :  { %v1614_v19 = vadd.f32 %v1606_v1, %v1605_v63  ;;  %2272 = vmatprep.subr.bf16.mxu1 %v2517_v26  ;;  %v1674_v16 = vrot.slane %v2157_v27, %v2853_v56 }
 0xa34   :  { %2251 = vmatpush3.bf16.msra.mxu0 %v2518_v15  ;;  %v2158_v15 = vld [vmem:[%s3447_s7 + $0x7] ss:$0 sm:$0xff] }
 0xa35   :  { %v1615_v35 = vadd.f32 %v1614_v19, %v1607_v4  ;;  %2273 = vmatpush3.bf16.msra.mxu1 %v2519_v14  ;;  %2252 = vmatprep.subr.bf16.mxu0 %v2520_v5 }
 0xa36   :  { %2274 = vmatprep.subr.bf16.mxu1 %v2521_v38 }
 0xa37   :  { %v1616_v11 = vadd.f32 %v1615_v35, %v1608_v2  ;;  %v1670_v2 = vrot.slane %v2157_v27, %v2859_v58  ;;  %v1678_v35 = vrot.slane %v2157_v27, %v3193_v50 }
 0xa38   :  { %2253 = vmatpush3.bf16.msra.mxu0 %v2522_v25  ;;  %v2191_v25 = vld [vmem:[%s3447_s7 + $0x8] ss:$0 sm:$0xff]  ;;  %s2710_s7 = scalar_lea.vmem %s2055_s29, 256 }
 0xa39   :  { %1617 = vadd.xlane.f32.xlu1 %v1616_v11  ;;  %2275 = vmatpush3.bf16.msra.mxu1 %v2523_v51  ;;  %v1666_v11 = vrot.slane %v2157_v27, %v2850_v55  ;;  %p2711_p6 = scmp.ne.s32.totalorder %s2055_s29, %s2710_s7  ;;  %p2716_p8 = scmp.lt.s32.totalorder %s2710_s7, %s2710_s7 }
 0xa3a   :  { %2254 = vmatprep.subr.bf16.mxu0 %v2524_v31  ;;  %2276 = vmatprep.subr.bf16.mxu1 %v2525_v39 }
 0xa3b   :  { %p2717_p9 = por %p2716_p8, %p2715_p7 }
 0xa3c   :  { %2255 = vmatpush3.bf16.msra.mxu0 %v2526_v12 }
 0xa3d   :  { %2277 = vmatpush3.bf16.msra.mxu1 %v2527_v7  ;;  %2256 = vmatprep.subr.bf16.mxu0 %v2528_v40  ;;  %p2718_p10 = pnand %p2717_p9, %p2711_p6 }
 0xa3e   :  { %2278 = vmatprep.subr.bf16.mxu1 %v2529_v60 }
 0xa40   :  { %2257 = vmatpush3.bf16.msra.mxu0 %v2530_v32  ;;  %v2043_v32 = vmul.f32 %v2191_v25, %v3066_v45 }
 0xa41   :  { %2279 = vmatpush3.bf16.msra.mxu1 %v2531_v23 }
 0xabb   :  { %v1613_v30 = vpop.xlane.xlu0 %1612 }
 0xabc   :  { %v1619_v33 = vmul.f32 0.001953125, %v1613_v30 }
 0xabe   :  { %v1621_v0 = vadd.f32 1e-05, %v1619_v33 }
 0xac0   :  { %2624 = vrsqrt.f32 %v1621_v0 }
 0xac2   :  { %v1618_v46 = vpop.xlane.xlu1 %1617 }
 0xac3   :  { %v1620_v54 = vmul.f32 0.001953125, %v1618_v46 }
 0xac5   :  { %v1622_v9 = vadd.f32 1e-05, %v1620_v54  ;;  %v2044_v54 = vmul.f32 %v2191_v25, %v3072_v48 }
 0xac7   :  { %2626 = vrsqrt.f32 %v1622_v9 }
 0xacd   :  { %v2625_v28 = vpop.eup %2624 }
 0xace   :  { %v1626_v63 = vmul.f32 %v2625_v28, %v3377_v34  ;;  %v1628_v1 = vmul.f32 %v2625_v28, %v3381_v18  ;;  %v1625_v4 = vmul.f32 %v2625_v28, %v3375_v3  ;;  %v1627_v19 = vmul.f32 %v2625_v28, %v3379_v10 }
 0xad0   :  { %v1655_v61 = vmul.f32 %v1641_v41, %v1626_v63  ;;  %v1657_v53 = vmul.f32 %v1649_v57, %v1628_v1  ;;  %v1654_v13 = vmul.f32 %v1637_v42, %v1625_v4  ;;  %v1656_v20 = vmul.f32 %v1645_v44, %v1627_v19 }
 0xad2   :  { %v1684_v55 = vadd.f32 %v1670_v2, %v1655_v61  ;;  %v1686_v22 = vadd.f32 %v1678_v35, %v1657_v53  ;;  %v1683_v56 = vadd.f32 %v1666_v11, %v1654_v13  ;;  %v1685_v21 = vadd.f32 %v1674_v16, %v1656_v20 }
 0xad4   :  { %v2627_v17 = vpop.eup %2626 }
 0xad5   :  { %v1630_v34 = vmul.f32 %v2627_v17, %v3393_v6  ;;  %v1632_v18 = vmul.f32 %v2627_v17, %v3397_v52  ;;  %v1629_v3 = vmul.f32 %v2627_v17, %v3391_v43  ;;  %v1631_v10 = vmul.f32 %v2627_v17, %v3395_v47 }
 0xad7   :  { %v1659_v58 = vmul.f32 %v1641_v41, %v1630_v34  ;;  %v1661_v59 = vmul.f32 %v1649_v57, %v1632_v18  ;;  %v1658_v50 = vmul.f32 %v1637_v42, %v1629_v3  ;;  %v1660_v49 = vmul.f32 %v1645_v44, %v1631_v10 }
 0xad9   :  { %v1688_v24 = vadd.f32 %v1670_v2, %v1659_v58  ;;  %v1690_v37 = vadd.f32 %v1678_v35, %v1661_v59  ;;  %v1687_v8 = vadd.f32 %v1666_v11, %v1658_v50  ;;  %v1689_v29 = vadd.f32 %v1674_v16, %v1660_v49 }
 0xadb   :  { %v1692_v62 = vpack.c.bf16 %v1688_v24, %v1684_v55  ;;  %v1694_v6 = vpack.c.bf16 %v1690_v37, %v1686_v22  ;;  %v1691_v26 = vpack.c.bf16 %v1687_v8, %v1683_v56  ;;  %v1693_v52 = vpack.c.bf16 %v1689_v29, %v1685_v21 }
 0xadd   :  { %1988 = vmatprep.mubr.bf16.mxu0 %v1692_v62  ;;  %2029 = vmatprep.mubr.bf16.mxu1 %v1694_v6 }
 0xade   :  { %1989 = vmatmul.mubr.bf16.vlgmr.msra.gmra.mxu0 %v1691_v26  ;;  %2030 = vmatmul.mubr.bf16.vlgmr.msra.gmra.mxu1 %v1693_v52 }
 0xb9e   :  { %v2258_v43 = vpop.f32.mrf.mxu0  ;;  %v2280_v47 = vpop.f32.mrf.mxu1 }
 0xba0   :  { %v2259_v14 = vpop.f32.mrf.mxu0  ;;  %v2281_v5 = vpop.f32.mrf.mxu1 }
 0xba1   :  { %v2260_v38 = vadd.f32 %v2259_v14, %v2258_v43  ;;  %v2282_v12 = vadd.f32 %v2281_v5, %v2280_v47 }
 0xba2   :  { %v2261_v51 = vpop.f32.mrf.mxu0  ;;  %v2283_v31 = vpop.f32.mrf.mxu1 }
 0xba3   :  { %v1991_v39 = vadd.f32 %v2260_v38, %v2158_v15 }
 0xba4   :  { %v2262_v7 = vpop.f32.mrf.mxu0  ;;  %v2284_v40 = vpop.f32.mrf.mxu1 }
 0xba5   :  { %v2032_v60 = vadd.f32 %v2282_v12, %v1991_v39  ;;  %v2263_v23 = vadd.f32 %v2262_v7, %v2261_v51  ;;  %v2285_v0 = vadd.f32 %v2284_v40, %v2283_v31 }
 0xba7   :  { %v2045_v30 = vadd.f32 %v2043_v32, %v2032_v60  ;;  %v1994_v33 = vadd.f32 %v2263_v23, %v2158_v15 }
 0xba9   :  { %2047 = vst [vmem:[#allocation10] sm:$0xff] %v2045_v30  ;;  %v2035_v46 = vadd.f32 %v2285_v0, %v1994_v33 }
 0xbab   :  { %v2046_v9 = vadd.f32 %v2044_v54, %v2035_v46 }
 0xbad   :  { %2048 = vst [vmem:[#allocation10 + $0x8] sm:$0xff] %v2046_v9 }
 0xbae   :  { %2721 = shalt.err (!%p2718_p10)
}
 0xbaf   :  { %s2750_s2 = smov 128   ;;  %s2751_s30 = smov 8  }
 0xbb0   :  { %2060 = dma.vmem_to_hbm [thread:$0]  %s2055_s29, 256, %s3449_s9, [#allocation4], %s2750_s2, %s2750_s2, %s2751_s30  }
 0xbb1   :  { %2736 = dma.done.wait [#allocation4], 256  }
 0xbb2   :  { %2737 = vsyncadd [#allocation4], 4294967040 }
 0xbb3   :  { %2064 = vsyncpa [#allocation3], 1 }
 0xbb4   :  { %2065 = vsyncpa [#allocation6], 1 }
 0xbb5   :  { %2066 = vsyncpa [#allocation9], 1 }
 0xbb6   :  { %2067 = vsyncpa [#allocation4], 1 }

</bundles_post_ra>
